<compile_context>
chip_gen: v7x
topology: tpu7x:2x2x1
jax: 0.10.0
libtpu: 0.0.40
codegen_flags: <defaults>
</compile_context>

<pallas_src>
import functools

import jax
import jax.numpy as jnp
from jax.experimental import pallas as pl
from jax.experimental.pallas import tpu as pltpu


# ----------------------------- Pallas kernel ------------------------------

def _layer_norm(x, gamma, beta, eps=1e-5):
    # x: (M, D); gamma/beta: (1, D). Biased variance, like torch.nn.LayerNorm.
    mean = jnp.mean(x, axis=-1, keepdims=True)
    var = jnp.mean((x - mean) ** 2, axis=-1, keepdims=True)
    inv = jax.lax.rsqrt(var + eps)
    return (x - mean) * inv * gamma + beta


def fused_encoder_kernel(
    x_ref,            # (1, B, S, D)   input of current stream (grid axis 0)
    wqkv_ref,         # (1, D, 3D)     in_proj weight (pre-transposed, q pre-scaled)
    bqkv_ref,         # (1, 1, 3D)
    wo_ref,           # (1, D, D)      out_proj weight (pre-transposed)
    bo_ref,           # (1, 1, D)
    w1_ref,           # (1, D, Dff)    linear1 weight (pre-transposed)
    b1_ref,           # (1, 1, Dff)
    w2_ref,           # (1, Dff, D)    linear2 weight (pre-transposed)
    b2_ref,           # (1, 1, D)
    g1_ref, be1_ref,  # (1, 1, D)      norm1 gamma / beta
    g2_ref, be2_ref,  # (1, 1, D)      norm2 gamma / beta
    o_ref,            # (1, B, S, D)   output of current stream
    acc_ref,          # VMEM scratch (B*S, D) f32: activation resident across layers
    *,
    nhead: int,
    batch: int,
    seq: int,
):
    layer = pl.program_id(1)
    n_layers = pl.num_programs(1)

    d_model = acc_ref.shape[-1]
    hd = d_model // nhead
    m = batch * seq

    # --- load input into the resident activation at the first layer ---
    @pl.when(layer == 0)
    def _():
        acc_ref[...] = x_ref[0].reshape(m, d_model).astype(jnp.float32)

    x = acc_ref[...]                                           # (M, D)

    # --- multi-head self-attention (eval mode: no dropout) ---
    qkv = jnp.dot(x, wqkv_ref[0], preferred_element_type=jnp.float32) + bqkv_ref[0]
    q = qkv[:, :d_model]              # 1/sqrt(hd) already folded into weights
    k = qkv[:, d_model:2 * d_model]
    v = qkv[:, 2 * d_model:]

    wo = wo_ref[0]                                             # (D, D)
    attn = jnp.zeros((m, d_model), jnp.float32)
    for h in range(nhead):                                     # static, nhead small
        lo = h * hd
        qh = q[:, lo:lo + hd].reshape(batch, seq, hd)          # (B, S, hd)
        kh = k[:, lo:lo + hd].reshape(batch, seq, hd)
        vh = v[:, lo:lo + hd].reshape(batch, seq, hd)
        s = jnp.einsum('bqd,bkd->bqk', qh, kh,
                       preferred_element_type=jnp.float32)     # (B, S, S)
        s = s - jnp.max(s, axis=-1, keepdims=True)
        p = jnp.exp(s)
        p = p * pl.reciprocal(jnp.sum(p, axis=-1, keepdims=True), approx=True)
        oh = jnp.einsum('bqk,bkd->bqd', p, vh,
                        preferred_element_type=jnp.float32)    # (B, S, hd)
        # fold the head directly into the output projection (no concat)
        attn = attn + jnp.dot(oh.reshape(m, hd), wo[lo:lo + hd, :],
                              preferred_element_type=jnp.float32)
    attn = attn + bo_ref[0]

    # --- residual + norm1 ---
    x1 = _layer_norm(x + attn, g1_ref[0], be1_ref[0])

    # --- feed-forward (relu) ---
    h1 = jnp.dot(x1, w1_ref[0], preferred_element_type=jnp.float32) + b1_ref[0]
    h1 = jnp.maximum(h1, 0.0)
    ff = jnp.dot(h1, w2_ref[0], preferred_element_type=jnp.float32) + b2_ref[0]

    # --- residual + norm2 ---
    out = _layer_norm(x1 + ff, g2_ref[0], be2_ref[0])
    acc_ref[...] = out

    # --- write the stream output only after the last layer ---
    @pl.when(layer == n_layers - 1)
    def _():
        o_ref[0] = out.reshape(batch, seq, d_model).astype(o_ref.dtype)


# ------------------------------ wrapper ------------------------------------

def cmre_encoder(v, a, layer_params, nhead):
    """CMRE_Encoder.forward: for each layer, v = enc(v); a = enc(a).

    v, a: (B, S, D) float32 (batch-major layout of PyTorch's (S, B, D)).
    layer_params: list of per-layer dicts (see init_layer_params).
    """
    B, S, D = v.shape
    L = len(layer_params)
    hd = D // nhead
    scale = 1.0 / (hd ** 0.5)

    x_all = jnp.stack([v, a], axis=0)                          # (2, B, S, D)

    def stack(name):
        return jnp.stack([p[name] for p in layer_params], axis=0)

    wqkv = stack("wqkv")                                       # (L, D, 3D)
    bqkv = stack("bqkv")                                       # (L, 1, 3D)
    # fold 1/sqrt(hd) into q weight + bias so the kernel skips the scale
    wqkv = wqkv.at[:, :, :D].multiply(scale)
    bqkv = bqkv.at[:, :, :D].multiply(scale)

    wo, bo = stack("wo"), stack("bo")
    w1, b1 = stack("w1"), stack("b1")
    w2, b2 = stack("w2"), stack("b2")
    g1, be1 = stack("g1"), stack("be1")
    g2, be2 = stack("g2"), stack("be2")

    def wspec(arr):
        # per-layer weight block, indexed by grid axis 1 (layer)
        shape = arr.shape
        nd = len(shape)
        return pl.BlockSpec((1,) + shape[1:],
                            lambda s, l, _nd=nd: (l,) + (0,) * (_nd - 1))

    kernel = functools.partial(fused_encoder_kernel, nhead=nhead, batch=B, seq=S)

    out = pl.pallas_call(
        kernel,
        out_shape=jax.ShapeDtypeStruct((2, B, S, D), v.dtype),
        grid_spec=pltpu.PrefetchScalarGridSpec(
            num_scalar_prefetch=0,
            grid=(2, L),                       # (stream, layer); layer sequential
            in_specs=[
                pl.BlockSpec((1, B, S, D), lambda s, l: (s, 0, 0, 0)),   # x
                wspec(wqkv), wspec(bqkv),
                wspec(wo), wspec(bo),
                wspec(w1), wspec(b1),
                wspec(w2), wspec(b2),
                wspec(g1), wspec(be1),
                wspec(g2), wspec(be2),
            ],
            out_specs=pl.BlockSpec((1, B, S, D), lambda s, l: (s, 0, 0, 0)),
            scratch_shapes=[pltpu.VMEM((B * S, D), jnp.float32)],
        ),
        compiler_params=pltpu.CompilerParams(
            dimension_semantics=("parallel", "arbitrary"),
        ),
    )(x_all, wqkv, bqkv, wo, bo, w1, b1, w2, b2, g1, be1, g2, be2)

    return out[0], out[1]


def init_layer_params(key, d_model, dim_feedforward):
    """Deterministic synthetic parameters for one EncoderLayer.

    Weights are stored pre-transposed to (in_features, out_features) so the
    kernel can do plain x @ W + b (PyTorch Linear is x @ W.T + b).
    """
    ks = jax.random.split(key, 6)
    s = 0.02
    return {
        "wqkv": s * jax.random.normal(ks[0], (d_model, 3 * d_model), jnp.float32),
        "bqkv": s * jax.random.normal(ks[1], (1, 3 * d_model), jnp.float32),
        "wo":   s * jax.random.normal(ks[2], (d_model, d_model), jnp.float32),
        "bo":   s * jax.random.normal(ks[3], (1, d_model), jnp.float32),
        "w1":   s * jax.random.normal(ks[4], (d_model, dim_feedforward), jnp.float32),
        "b1":   jnp.zeros((1, dim_feedforward), jnp.float32),
        "w2":   s * jax.random.normal(ks[5], (dim_feedforward, d_model), jnp.float32),
        "b2":   jnp.zeros((1, d_model), jnp.float32),
        "g1":   jnp.ones((1, d_model), jnp.float32),
        "be1":  jnp.zeros((1, d_model), jnp.float32),
        "g2":   jnp.ones((1, d_model), jnp.float32),
        "be2":  jnp.zeros((1, d_model), jnp.float32),
    }


# -------------------------------- main --------------------------------------

if __name__ == "__main__":
    d_model = 32
    nhead = 4
    num_layers = 2
    dim_feedforward = 1024   # EncoderLayer default
    B, S = 2, 8

    key = jax.random.PRNGKey(0)
    kv, ka, kp = jax.random.split(key, 3)

    # layout: (B, S, D) batch-major (== PyTorch (S, B, D) transposed)
    v = jax.random.normal(kv, (B, S, d_model), jnp.float32)
    a = jax.random.normal(ka, (B, S, d_model), jnp.float32)

    layer_keys = jax.random.split(kp, num_layers)
    layer_params = [init_layer_params(k, d_model, dim_feedforward) for k in layer_keys]

    v_out, a_out = cmre_encoder(v, a, layer_params, nhead)
    jax.block_until_ready((v_out, a_out))

    assert v_out.shape == (B, S, d_model) and a_out.shape == (B, S, d_model)
    assert bool(jnp.all(jnp.isfinite(v_out))) and bool(jnp.all(jnp.isfinite(a_out)))
    print("KERNEL_OK")
</pallas_src>

<mosaic_0001>
module attributes {stable_mosaic.version = 11 : i64} {
  func.func @fused_encoder_kernel(%arg0: i32, %arg1: i32, %arg2: memref<1x2x8x32xf32, #tpu.memory_space<vmem>>, %arg3: memref<1x32x96xf32, #tpu.memory_space<vmem>>, %arg4: memref<1x1x96xf32, #tpu.memory_space<vmem>>, %arg5: memref<1x32x32xf32, #tpu.memory_space<vmem>>, %arg6: memref<1x1x32xf32, #tpu.memory_space<vmem>>, %arg7: memref<1x32x1024xf32, #tpu.memory_space<vmem>>, %arg8: memref<1x1x1024xf32, #tpu.memory_space<vmem>>, %arg9: memref<1x1024x32xf32, #tpu.memory_space<vmem>>, %arg10: memref<1x1x32xf32, #tpu.memory_space<vmem>>, %arg11: memref<1x1x32xf32, #tpu.memory_space<vmem>>, %arg12: memref<1x1x32xf32, #tpu.memory_space<vmem>>, %arg13: memref<1x1x32xf32, #tpu.memory_space<vmem>>, %arg14: memref<1x1x32xf32, #tpu.memory_space<vmem>>, %arg15: memref<1x2x8x32xf32, #tpu.memory_space<vmem>>, %arg16: memref<16x32xf32, #tpu.memory_space<vmem>>) attributes {dimension_semantics = [#tpu.dimension_semantics<parallel>, #tpu.dimension_semantics<arbitrary>], iteration_bounds = array<i64: 2, 2>, scalar_prefetch = 0 : i64, scratch_operands = 1 : i64, tpu.core_type = #tpu.core_type<tc>, window_params = [{transform_indices = @transform_0, window_bounds = array<i64: 1, 2, 8, 32>}, {transform_indices = @transform_1, window_bounds = array<i64: 1, 32, 96>}, {transform_indices = @transform_2, window_bounds = array<i64: 1, 1, 96>}, {transform_indices = @transform_3, window_bounds = array<i64: 1, 32, 32>}, {transform_indices = @transform_4, window_bounds = array<i64: 1, 1, 32>}, {transform_indices = @transform_5, window_bounds = array<i64: 1, 32, 1024>}, {transform_indices = @transform_6, window_bounds = array<i64: 1, 1, 1024>}, {transform_indices = @transform_7, window_bounds = array<i64: 1, 1024, 32>}, {transform_indices = @transform_8, window_bounds = array<i64: 1, 1, 32>}, {transform_indices = @transform_9, window_bounds = array<i64: 1, 1, 32>}, {transform_indices = @transform_10, window_bounds = array<i64: 1, 1, 32>}, {transform_indices = @transform_11, window_bounds = array<i64: 1, 1, 32>}, {transform_indices = @transform_12, window_bounds = array<i64: 1, 1, 32>}, {transform_indices = @transform_13, window_bounds = array<i64: 1, 2, 8, 32>}]} {
    %c0_i32 = arith.constant 0 : i32
    %0 = arith.cmpi eq, %arg1, %c0_i32 : i32
    %1 = arith.extui %0 : i1 to i32
    %c0_i32_0 = arith.constant 0 : i32
    %2 = arith.cmpi ne, %1, %c0_i32_0 : i32
    scf.if %2 {
      %c0_75 = arith.constant 0 : index
      %c0_76 = arith.constant 0 : index
      %c0_77 = arith.constant 0 : index
      %c0_78 = arith.constant 0 : index
      %183 = vector.load %arg2[%c0_75, %c0_76, %c0_77, %c0_78] : memref<1x2x8x32xf32, #tpu.memory_space<vmem>>, vector<1x2x8x32xf32>
      %184 = vector.shape_cast %183 : vector<1x2x8x32xf32> to vector<2x8x32xf32>
      %185 = vector.shape_cast %184 : vector<2x8x32xf32> to vector<16x32xf32>
      %c0_79 = arith.constant 0 : index
      %c0_80 = arith.constant 0 : index
      %186 = vector.load %arg16[%c0_79, %c0_80] : memref<16x32xf32, #tpu.memory_space<vmem>>, vector<16x32xf32>
      tpu.vector_store %arg16[%c0_79, %c0_80], %185 {strides = array<i32>} : memref<16x32xf32, #tpu.memory_space<vmem>>, vector<16x32xf32>,
    } else {
    }
    %c0 = arith.constant 0 : index
    %c0_1 = arith.constant 0 : index
    %3 = vector.load %arg16[%c0, %c0_1] : memref<16x32xf32, #tpu.memory_space<vmem>>, vector<16x32xf32>
    %c0_2 = arith.constant 0 : index
    %c0_3 = arith.constant 0 : index
    %c0_4 = arith.constant 0 : index
    %4 = vector.load %arg3[%c0_2, %c0_3, %c0_4] : memref<1x32x96xf32, #tpu.memory_space<vmem>>, vector<1x32x96xf32>
    %5 = vector.shape_cast %4 : vector<1x32x96xf32> to vector<32x96xf32>
    %cst = arith.constant dense<0.000000e+00> : vector<16x96xf32>
    %6 = tpu.matmul %3, %5, %cst {dimension_numbers = #tpu.dot_dimension_numbers<[1], [0], [0], [1], [0, 0, 1, 1], [], []>} : vector<16x32xf32>, vector<32x96xf32>, vector<16x96xf32> -> vector<16x96xf32>
    %c0_5 = arith.constant 0 : index
    %c0_6 = arith.constant 0 : index
    %c0_7 = arith.constant 0 : index
    %7 = vector.load %arg4[%c0_5, %c0_6, %c0_7] : memref<1x1x96xf32, #tpu.memory_space<vmem>>, vector<1x1x96xf32>
    %8 = vector.shape_cast %7 : vector<1x1x96xf32> to vector<1x96xf32>
    %9 = vector.broadcast %8 : vector<1x96xf32> to vector<16x96xf32>
    %10 = arith.addf %6, %9 : vector<16x96xf32>
    %11 = vector.extract_strided_slice %10 {offsets = [0, 0], sizes = [16, 32], strides = [1, 1]} : vector<16x96xf32> to vector<16x32xf32>
    %12 = vector.extract_strided_slice %10 {offsets = [0, 32], sizes = [16, 32], strides = [1, 1]} : vector<16x96xf32> to vector<16x32xf32>
    %13 = vector.extract_strided_slice %10 {offsets = [0, 64], sizes = [16, 32], strides = [1, 1]} : vector<16x96xf32> to vector<16x32xf32>
    %c0_8 = arith.constant 0 : index
    %c0_9 = arith.constant 0 : index
    %c0_10 = arith.constant 0 : index
    %14 = vector.load %arg5[%c0_8, %c0_9, %c0_10] : memref<1x32x32xf32, #tpu.memory_space<vmem>>, vector<1x32x32xf32>
    %15 = vector.shape_cast %14 : vector<1x32x32xf32> to vector<32x32xf32>
    %cst_11 = arith.constant 0.000000e+00 : f32
    %16 = vector.broadcast %cst_11 : f32 to vector<16x32xf32>
    %17 = vector.extract_strided_slice %11 {offsets = [0, 0], sizes = [16, 8], strides = [1, 1]} : vector<16x32xf32> to vector<16x8xf32>
    %18 = vector.shape_cast %17 : vector<16x8xf32> to vector<2x8x8xf32>
    %19 = vector.extract_strided_slice %12 {offsets = [0, 0], sizes = [16, 8], strides = [1, 1]} : vector<16x32xf32> to vector<16x8xf32>
    %20 = vector.shape_cast %19 : vector<16x8xf32> to vector<2x8x8xf32>
    %21 = vector.extract_strided_slice %13 {offsets = [0, 0], sizes = [16, 8], strides = [1, 1]} : vector<16x32xf32> to vector<16x8xf32>
    %22 = vector.shape_cast %21 : vector<16x8xf32> to vector<2x8x8xf32>
    "tpu.trace_start"() <{level = 10 : i32, message = "bqd,bkd->bqk"}> : () -> ()
    %cst_12 = arith.constant dense<0.000000e+00> : vector<2x8x8xf32>
    %23 = tpu.matmul %18, %20, %cst_12 {dimension_numbers = #tpu.dot_dimension_numbers<[2], [2], [1], [1], [0, 0, 0, 1, 1, 1], [0], [0]>} : vector<2x8x8xf32>, vector<2x8x8xf32>, vector<2x8x8xf32> -> vector<2x8x8xf32>
    "tpu.trace_stop"() : () -> ()
    %cst_13 = arith.constant dense<0xFF800000> : vector<2x8xf32>
    %24 = vector.multi_reduction <maximumf>, %23, %cst_13 [2] : vector<2x8x8xf32> to vector<2x8xf32>
    %25 = vector.shape_cast %24 : vector<2x8xf32> to vector<2x8x1xf32>
    %26 = vector.broadcast %25 : vector<2x8x1xf32> to vector<2x8x8xf32>
    %27 = arith.subf %23, %26 : vector<2x8x8xf32>
    %28 = math.exp %27 : vector<2x8x8xf32>
    %cst_14 = arith.constant dense<0.000000e+00> : vector<2x8xf32>
    %29 = vector.multi_reduction <add>, %28, %cst_14 [2] : vector<2x8x8xf32> to vector<2x8xf32>
    %30 = vector.shape_cast %29 : vector<2x8xf32> to vector<2x8x1xf32>
    %31 = tpu.reciprocal %30 {approx = true} : vector<2x8x1xf32> -> vector<2x8x1xf32>
    %32 = vector.broadcast %31 : vector<2x8x1xf32> to vector<2x8x8xf32>
    %33 = arith.mulf %28, %32 : vector<2x8x8xf32>
    "tpu.trace_start"() <{level = 10 : i32, message = "bqk,bkd->bqd"}> : () -> ()
    %cst_15 = arith.constant dense<0.000000e+00> : vector<2x8x8xf32>
    %34 = tpu.matmul %33, %22, %cst_15 {dimension_numbers = #tpu.dot_dimension_numbers<[2], [1], [1], [2], [0, 0, 0, 1, 1, 2], [0], [0]>} : vector<2x8x8xf32>, vector<2x8x8xf32>, vector<2x8x8xf32> -> vector<2x8x8xf32>
    "tpu.trace_stop"() : () -> ()
    %35 = vector.shape_cast %34 : vector<2x8x8xf32> to vector<16x8xf32>
    %36 = vector.extract_strided_slice %15 {offsets = [0, 0], sizes = [8, 32], strides = [1, 1]} : vector<32x32xf32> to vector<8x32xf32>
    %cst_16 = arith.constant dense<0.000000e+00> : vector<16x32xf32>
    %37 = tpu.matmul %35, %36, %cst_16 {dimension_numbers = #tpu.dot_dimension_numbers<[1], [0], [0], [1], [0, 0, 1, 1], [], []>} : vector<16x8xf32>, vector<8x32xf32>, vector<16x32xf32> -> vector<16x32xf32>
    %38 = arith.addf %16, %37 : vector<16x32xf32>
    %39 = vector.extract_strided_slice %11 {offsets = [0, 8], sizes = [16, 8], strides = [1, 1]} : vector<16x32xf32> to vector<16x8xf32>
    %40 = vector.shape_cast %39 : vector<16x8xf32> to vector<2x8x8xf32>
    %41 = vector.extract_strided_slice %12 {offsets = [0, 8], sizes = [16, 8], strides = [1, 1]} : vector<16x32xf32> to vector<16x8xf32>
    %42 = vector.shape_cast %41 : vector<16x8xf32> to vector<2x8x8xf32>
    %43 = vector.extract_strided_slice %13 {offsets = [0, 8], sizes = [16, 8], strides = [1, 1]} : vector<16x32xf32> to vector<16x8xf32>
    %44 = vector.shape_cast %43 : vector<16x8xf32> to vector<2x8x8xf32>
    "tpu.trace_start"() <{level = 10 : i32, message = "bqd,bkd->bqk"}> : () -> ()
    %cst_17 = arith.constant dense<0.000000e+00> : vector<2x8x8xf32>
    %45 = tpu.matmul %40, %42, %cst_17 {dimension_numbers = #tpu.dot_dimension_numbers<[2], [2], [1], [1], [0, 0, 0, 1, 1, 1], [0], [0]>} : vector<2x8x8xf32>, vector<2x8x8xf32>, vector<2x8x8xf32> -> vector<2x8x8xf32>
    "tpu.trace_stop"() : () -> ()
    %cst_18 = arith.constant dense<0xFF800000> : vector<2x8xf32>
    %46 = vector.multi_reduction <maximumf>, %45, %cst_18 [2] : vector<2x8x8xf32> to vector<2x8xf32>
    %47 = vector.shape_cast %46 : vector<2x8xf32> to vector<2x8x1xf32>
    %48 = vector.broadcast %47 : vector<2x8x1xf32> to vector<2x8x8xf32>
    %49 = arith.subf %45, %48 : vector<2x8x8xf32>
    %50 = math.exp %49 : vector<2x8x8xf32>
    %cst_19 = arith.constant dense<0.000000e+00> : vector<2x8xf32>
    %51 = vector.multi_reduction <add>, %50, %cst_19 [2] : vector<2x8x8xf32> to vector<2x8xf32>
    %52 = vector.shape_cast %51 : vector<2x8xf32> to vector<2x8x1xf32>
    %53 = tpu.reciprocal %52 {approx = true} : vector<2x8x1xf32> -> vector<2x8x1xf32>
    %54 = vector.broadcast %53 : vector<2x8x1xf32> to vector<2x8x8xf32>
    %55 = arith.mulf %50, %54 : vector<2x8x8xf32>
    "tpu.trace_start"() <{level = 10 : i32, message = "bqk,bkd->bqd"}> : () -> ()
    %cst_20 = arith.constant dense<0.000000e+00> : vector<2x8x8xf32>
    %56 = tpu.matmul %55, %44, %cst_20 {dimension_numbers = #tpu.dot_dimension_numbers<[2], [1], [1], [2], [0, 0, 0, 1, 1, 2], [0], [0]>} : vector<2x8x8xf32>, vector<2x8x8xf32>, vector<2x8x8xf32> -> vector<2x8x8xf32>
    "tpu.trace_stop"() : () -> ()
    %57 = vector.shape_cast %56 : vector<2x8x8xf32> to vector<16x8xf32>
    %58 = vector.extract_strided_slice %15 {offsets = [8, 0], sizes = [8, 32], strides = [1, 1]} : vector<32x32xf32> to vector<8x32xf32>
    %cst_21 = arith.constant dense<0.000000e+00> : vector<16x32xf32>
    %59 = tpu.matmul %57, %58, %cst_21 {dimension_numbers = #tpu.dot_dimension_numbers<[1], [0], [0], [1], [0, 0, 1, 1], [], []>} : vector<16x8xf32>, vector<8x32xf32>, vector<16x32xf32> -> vector<16x32xf32>
    %60 = arith.addf %38, %59 : vector<16x32xf32>
    %61 = vector.extract_strided_slice %11 {offsets = [0, 16], sizes = [16, 8], strides = [1, 1]} : vector<16x32xf32> to vector<16x8xf32>
    %62 = vector.shape_cast %61 : vector<16x8xf32> to vector<2x8x8xf32>
    %63 = vector.extract_strided_slice %12 {offsets = [0, 16], sizes = [16, 8], strides = [1, 1]} : vector<16x32xf32> to vector<16x8xf32>
    %64 = vector.shape_cast %63 : vector<16x8xf32> to vector<2x8x8xf32>
    %65 = vector.extract_strided_slice %13 {offsets = [0, 16], sizes = [16, 8], strides = [1, 1]} : vector<16x32xf32> to vector<16x8xf32>
    %66 = vector.shape_cast %65 : vector<16x8xf32> to vector<2x8x8xf32>
    "tpu.trace_start"() <{level = 10 : i32, message = "bqd,bkd->bqk"}> : () -> ()
    %cst_22 = arith.constant dense<0.000000e+00> : vector<2x8x8xf32>
    %67 = tpu.matmul %62, %64, %cst_22 {dimension_numbers = #tpu.dot_dimension_numbers<[2], [2], [1], [1], [0, 0, 0, 1, 1, 1], [0], [0]>} : vector<2x8x8xf32>, vector<2x8x8xf32>, vector<2x8x8xf32> -> vector<2x8x8xf32>
    "tpu.trace_stop"() : () -> ()
    %cst_23 = arith.constant dense<0xFF800000> : vector<2x8xf32>
    %68 = vector.multi_reduction <maximumf>, %67, %cst_23 [2] : vector<2x8x8xf32> to vector<2x8xf32>
    %69 = vector.shape_cast %68 : vector<2x8xf32> to vector<2x8x1xf32>
    %70 = vector.broadcast %69 : vector<2x8x1xf32> to vector<2x8x8xf32>
    %71 = arith.subf %67, %70 : vector<2x8x8xf32>
    %72 = math.exp %71 : vector<2x8x8xf32>
    %cst_24 = arith.constant dense<0.000000e+00> : vector<2x8xf32>
    %73 = vector.multi_reduction <add>, %72, %cst_24 [2] : vector<2x8x8xf32> to vector<2x8xf32>
    %74 = vector.shape_cast %73 : vector<2x8xf32> to vector<2x8x1xf32>
    %75 = tpu.reciprocal %74 {approx = true} : vector<2x8x1xf32> -> vector<2x8x1xf32>
    %76 = vector.broadcast %75 : vector<2x8x1xf32> to vector<2x8x8xf32>
    %77 = arith.mulf %72, %76 : vector<2x8x8xf32>
    "tpu.trace_start"() <{level = 10 : i32, message = "bqk,bkd->bqd"}> : () -> ()
    %cst_25 = arith.constant dense<0.000000e+00> : vector<2x8x8xf32>
    %78 = tpu.matmul %77, %66, %cst_25 {dimension_numbers = #tpu.dot_dimension_numbers<[2], [1], [1], [2], [0, 0, 0, 1, 1, 2], [0], [0]>} : vector<2x8x8xf32>, vector<2x8x8xf32>, vector<2x8x8xf32> -> vector<2x8x8xf32>
    "tpu.trace_stop"() : () -> ()
    %79 = vector.shape_cast %78 : vector<2x8x8xf32> to vector<16x8xf32>
    %80 = vector.extract_strided_slice %15 {offsets = [16, 0], sizes = [8, 32], strides = [1, 1]} : vector<32x32xf32> to vector<8x32xf32>
    %cst_26 = arith.constant dense<0.000000e+00> : vector<16x32xf32>
    %81 = tpu.matmul %79, %80, %cst_26 {dimension_numbers = #tpu.dot_dimension_numbers<[1], [0], [0], [1], [0, 0, 1, 1], [], []>} : vector<16x8xf32>, vector<8x32xf32>, vector<16x32xf32> -> vector<16x32xf32>
    %82 = arith.addf %60, %81 : vector<16x32xf32>
    %83 = vector.extract_strided_slice %11 {offsets = [0, 24], sizes = [16, 8], strides = [1, 1]} : vector<16x32xf32> to vector<16x8xf32>
    %84 = vector.shape_cast %83 : vector<16x8xf32> to vector<2x8x8xf32>
    %85 = vector.extract_strided_slice %12 {offsets = [0, 24], sizes = [16, 8], strides = [1, 1]} : vector<16x32xf32> to vector<16x8xf32>
    %86 = vector.shape_cast %85 : vector<16x8xf32> to vector<2x8x8xf32>
    %87 = vector.extract_strided_slice %13 {offsets = [0, 24], sizes = [16, 8], strides = [1, 1]} : vector<16x32xf32> to vector<16x8xf32>
    %88 = vector.shape_cast %87 : vector<16x8xf32> to vector<2x8x8xf32>
    "tpu.trace_start"() <{level = 10 : i32, message = "bqd,bkd->bqk"}> : () -> ()
    %cst_27 = arith.constant dense<0.000000e+00> : vector<2x8x8xf32>
    %89 = tpu.matmul %84, %86, %cst_27 {dimension_numbers = #tpu.dot_dimension_numbers<[2], [2], [1], [1], [0, 0, 0, 1, 1, 1], [0], [0]>} : vector<2x8x8xf32>, vector<2x8x8xf32>, vector<2x8x8xf32> -> vector<2x8x8xf32>
    "tpu.trace_stop"() : () -> ()
    %cst_28 = arith.constant dense<0xFF800000> : vector<2x8xf32>
    %90 = vector.multi_reduction <maximumf>, %89, %cst_28 [2] : vector<2x8x8xf32> to vector<2x8xf32>
    %91 = vector.shape_cast %90 : vector<2x8xf32> to vector<2x8x1xf32>
    %92 = vector.broadcast %91 : vector<2x8x1xf32> to vector<2x8x8xf32>
    %93 = arith.subf %89, %92 : vector<2x8x8xf32>
    %94 = math.exp %93 : vector<2x8x8xf32>
    %cst_29 = arith.constant dense<0.000000e+00> : vector<2x8xf32>
    %95 = vector.multi_reduction <add>, %94, %cst_29 [2] : vector<2x8x8xf32> to vector<2x8xf32>
    %96 = vector.shape_cast %95 : vector<2x8xf32> to vector<2x8x1xf32>
    %97 = tpu.reciprocal %96 {approx = true} : vector<2x8x1xf32> -> vector<2x8x1xf32>
    %98 = vector.broadcast %97 : vector<2x8x1xf32> to vector<2x8x8xf32>
    %99 = arith.mulf %94, %98 : vector<2x8x8xf32>
    "tpu.trace_start"() <{level = 10 : i32, message = "bqk,bkd->bqd"}> : () -> ()
    %cst_30 = arith.constant dense<0.000000e+00> : vector<2x8x8xf32>
    %100 = tpu.matmul %99, %88, %cst_30 {dimension_numbers = #tpu.dot_dimension_numbers<[2], [1], [1], [2], [0, 0, 0, 1, 1, 2], [0], [0]>} : vector<2x8x8xf32>, vector<2x8x8xf32>, vector<2x8x8xf32> -> vector<2x8x8xf32>
    "tpu.trace_stop"() : () -> ()
    %101 = vector.shape_cast %100 : vector<2x8x8xf32> to vector<16x8xf32>
    %102 = vector.extract_strided_slice %15 {offsets = [24, 0], sizes = [8, 32], strides = [1, 1]} : vector<32x32xf32> to vector<8x32xf32>
    %cst_31 = arith.constant dense<0.000000e+00> : vector<16x32xf32>
    %103 = tpu.matmul %101, %102, %cst_31 {dimension_numbers = #tpu.dot_dimension_numbers<[1], [0], [0], [1], [0, 0, 1, 1], [], []>} : vector<16x8xf32>, vector<8x32xf32>, vector<16x32xf32> -> vector<16x32xf32>
    %104 = arith.addf %82, %103 : vector<16x32xf32>
    %c0_32 = arith.constant 0 : index
    %c0_33 = arith.constant 0 : index
    %c0_34 = arith.constant 0 : index
    %105 = vector.load %arg6[%c0_32, %c0_33, %c0_34] : memref<1x1x32xf32, #tpu.memory_space<vmem>>, vector<1x1x32xf32>
    %106 = vector.shape_cast %105 : vector<1x1x32xf32> to vector<1x32xf32>
    %107 = vector.broadcast %106 : vector<1x32xf32> to vector<16x32xf32>
    %108 = arith.addf %104, %107 : vector<16x32xf32>
    %109 = arith.addf %3, %108 : vector<16x32xf32>
    %c0_35 = arith.constant 0 : index
    %c0_36 = arith.constant 0 : index
    %c0_37 = arith.constant 0 : index
    %110 = vector.load %arg11[%c0_35, %c0_36, %c0_37] : memref<1x1x32xf32, #tpu.memory_space<vmem>>, vector<1x1x32xf32>
    %111 = vector.shape_cast %110 : vector<1x1x32xf32> to vector<1x32xf32>
    %c0_38 = arith.constant 0 : index
    %c0_39 = arith.constant 0 : index
    %c0_40 = arith.constant 0 : index
    %112 = vector.load %arg12[%c0_38, %c0_39, %c0_40] : memref<1x1x32xf32, #tpu.memory_space<vmem>>, vector<1x1x32xf32>
    %113 = vector.shape_cast %112 : vector<1x1x32xf32> to vector<1x32xf32>
    %cst_41 = arith.constant dense<0.000000e+00> : vector<16xf32>
    %114 = vector.multi_reduction <add>, %109, %cst_41 [1] : vector<16x32xf32> to vector<16xf32>
    %115 = vector.shape_cast %114 : vector<16xf32> to vector<16x1xf32>
    %cst_42 = arith.constant 3.200000e+01 : f32
    %116 = vector.broadcast %cst_42 : f32 to vector<16x1xf32>
    %117 = arith.divf %115, %116 : vector<16x1xf32>
    %118 = vector.broadcast %117 : vector<16x1xf32> to vector<16x32xf32>
    %119 = arith.subf %109, %118 : vector<16x32xf32>
    %120 = arith.mulf %119, %119 : vector<16x32xf32>
    %cst_43 = arith.constant dense<0.000000e+00> : vector<16xf32>
    %121 = vector.multi_reduction <add>, %120, %cst_43 [1] : vector<16x32xf32> to vector<16xf32>
    %122 = vector.shape_cast %121 : vector<16xf32> to vector<16x1xf32>
    %cst_44 = arith.constant 3.200000e+01 : f32
    %123 = vector.broadcast %cst_44 : f32 to vector<16x1xf32>
    %124 = arith.divf %122, %123 : vector<16x1xf32>
    %cst_45 = arith.constant 9.99999974E-6 : f32
    %125 = vector.broadcast %cst_45 : f32 to vector<16x1xf32>
    %126 = arith.addf %124, %125 : vector<16x1xf32>
    %127 = math.rsqrt %126 : vector<16x1xf32>
    %128 = vector.broadcast %117 : vector<16x1xf32> to vector<16x32xf32>
    %129 = arith.subf %109, %128 : vector<16x32xf32>
    %130 = vector.broadcast %127 : vector<16x1xf32> to vector<16x32xf32>
    %131 = arith.mulf %129, %130 : vector<16x32xf32>
    %132 = vector.broadcast %111 : vector<1x32xf32> to vector<16x32xf32>
    %133 = arith.mulf %131, %132 : vector<16x32xf32>
    %134 = vector.broadcast %113 : vector<1x32xf32> to vector<16x32xf32>
    %135 = arith.addf %133, %134 : vector<16x32xf32>
    %c0_46 = arith.constant 0 : index
    %c0_47 = arith.constant 0 : index
    %c0_48 = arith.constant 0 : index
    %136 = vector.load %arg7[%c0_46, %c0_47, %c0_48] : memref<1x32x1024xf32, #tpu.memory_space<vmem>>, vector<1x32x1024xf32>
    %137 = vector.shape_cast %136 : vector<1x32x1024xf32> to vector<32x1024xf32>
    %cst_49 = arith.constant dense<0.000000e+00> : vector<16x1024xf32>
    %138 = tpu.matmul %135, %137, %cst_49 {dimension_numbers = #tpu.dot_dimension_numbers<[1], [0], [0], [1], [0, 0, 1, 1], [], []>} : vector<16x32xf32>, vector<32x1024xf32>, vector<16x1024xf32> -> vector<16x1024xf32>
    %c0_50 = arith.constant 0 : index
    %c0_51 = arith.constant 0 : index
    %c0_52 = arith.constant 0 : index
    %139 = vector.load %arg8[%c0_50, %c0_51, %c0_52] : memref<1x1x1024xf32, #tpu.memory_space<vmem>>, vector<1x1x1024xf32>
    %140 = vector.shape_cast %139 : vector<1x1x1024xf32> to vector<1x1024xf32>
    %141 = vector.broadcast %140 : vector<1x1024xf32> to vector<16x1024xf32>
    %142 = arith.addf %138, %141 : vector<16x1024xf32>
    %cst_53 = arith.constant 0.000000e+00 : f32
    %143 = vector.broadcast %cst_53 : f32 to vector<16x1024xf32>
    %144 = arith.maximumf %142, %143 : vector<16x1024xf32>
    %c0_54 = arith.constant 0 : index
    %c0_55 = arith.constant 0 : index
    %c0_56 = arith.constant 0 : index
    %145 = vector.load %arg9[%c0_54, %c0_55, %c0_56] : memref<1x1024x32xf32, #tpu.memory_space<vmem>>, vector<1x1024x32xf32>
    %146 = vector.shape_cast %145 : vector<1x1024x32xf32> to vector<1024x32xf32>
    %cst_57 = arith.constant dense<0.000000e+00> : vector<16x32xf32>
    %147 = tpu.matmul %144, %146, %cst_57 {dimension_numbers = #tpu.dot_dimension_numbers<[1], [0], [0], [1], [0, 0, 1, 1], [], []>} : vector<16x1024xf32>, vector<1024x32xf32>, vector<16x32xf32> -> vector<16x32xf32>
    %c0_58 = arith.constant 0 : index
    %c0_59 = arith.constant 0 : index
    %c0_60 = arith.constant 0 : index
    %148 = vector.load %arg10[%c0_58, %c0_59, %c0_60] : memref<1x1x32xf32, #tpu.memory_space<vmem>>, vector<1x1x32xf32>
    %149 = vector.shape_cast %148 : vector<1x1x32xf32> to vector<1x32xf32>
    %150 = vector.broadcast %149 : vector<1x32xf32> to vector<16x32xf32>
    %151 = arith.addf %147, %150 : vector<16x32xf32>
    %152 = arith.addf %135, %151 : vector<16x32xf32>
    %c0_61 = arith.constant 0 : index
    %c0_62 = arith.constant 0 : index
    %c0_63 = arith.constant 0 : index
    %153 = vector.load %arg13[%c0_61, %c0_62, %c0_63] : memref<1x1x32xf32, #tpu.memory_space<vmem>>, vector<1x1x32xf32>
    %154 = vector.shape_cast %153 : vector<1x1x32xf32> to vector<1x32xf32>
    %c0_64 = arith.constant 0 : index
    %c0_65 = arith.constant 0 : index
    %c0_66 = arith.constant 0 : index
    %155 = vector.load %arg14[%c0_64, %c0_65, %c0_66] : memref<1x1x32xf32, #tpu.memory_space<vmem>>, vector<1x1x32xf32>
    %156 = vector.shape_cast %155 : vector<1x1x32xf32> to vector<1x32xf32>
    %cst_67 = arith.constant dense<0.000000e+00> : vector<16xf32>
    %157 = vector.multi_reduction <add>, %152, %cst_67 [1] : vector<16x32xf32> to vector<16xf32>
    %158 = vector.shape_cast %157 : vector<16xf32> to vector<16x1xf32>
    %cst_68 = arith.constant 3.200000e+01 : f32
    %159 = vector.broadcast %cst_68 : f32 to vector<16x1xf32>
    %160 = arith.divf %158, %159 : vector<16x1xf32>
    %161 = vector.broadcast %160 : vector<16x1xf32> to vector<16x32xf32>
    %162 = arith.subf %152, %161 : vector<16x32xf32>
    %163 = arith.mulf %162, %162 : vector<16x32xf32>
    %cst_69 = arith.constant dense<0.000000e+00> : vector<16xf32>
    %164 = vector.multi_reduction <add>, %163, %cst_69 [1] : vector<16x32xf32> to vector<16xf32>
    %165 = vector.shape_cast %164 : vector<16xf32> to vector<16x1xf32>
    %cst_70 = arith.constant 3.200000e+01 : f32
    %166 = vector.broadcast %cst_70 : f32 to vector<16x1xf32>
    %167 = arith.divf %165, %166 : vector<16x1xf32>
    %cst_71 = arith.constant 9.99999974E-6 : f32
    %168 = vector.broadcast %cst_71 : f32 to vector<16x1xf32>
    %169 = arith.addf %167, %168 : vector<16x1xf32>
    %170 = math.rsqrt %169 : vector<16x1xf32>
    %171 = vector.broadcast %160 : vector<16x1xf32> to vector<16x32xf32>
    %172 = arith.subf %152, %171 : vector<16x32xf32>
    %173 = vector.broadcast %170 : vector<16x1xf32> to vector<16x32xf32>
    %174 = arith.mulf %172, %173 : vector<16x32xf32>
    %175 = vector.broadcast %154 : vector<1x32xf32> to vector<16x32xf32>
    %176 = arith.mulf %174, %175 : vector<16x32xf32>
    %177 = vector.broadcast %156 : vector<1x32xf32> to vector<16x32xf32>
    %178 = arith.addf %176, %177 : vector<16x32xf32>
    %c0_72 = arith.constant 0 : index
    %c0_73 = arith.constant 0 : index
    %179 = vector.load %arg16[%c0_72, %c0_73] : memref<16x32xf32, #tpu.memory_space<vmem>>, vector<16x32xf32>
    tpu.vector_store %arg16[%c0_72, %c0_73], %178 {strides = array<i32>} : memref<16x32xf32, #tpu.memory_space<vmem>>, vector<16x32xf32>,
    %c1_i32 = arith.constant 1 : i32
    %180 = arith.cmpi eq, %arg1, %c1_i32 : i32
    %181 = arith.extui %180 : i1 to i32
    %c0_i32_74 = arith.constant 0 : i32
    %182 = arith.cmpi ne, %181, %c0_i32_74 : i32
    scf.if %182 {
      %183 = vector.shape_cast %178 : vector<16x32xf32> to vector<2x8x32xf32>
      %c0_75 = arith.constant 0 : index
      %c0_76 = arith.constant 0 : index
      %c0_77 = arith.constant 0 : index
      %c0_78 = arith.constant 0 : index
      %184 = vector.load %arg15[%c0_75, %c0_76, %c0_77, %c0_78] : memref<1x2x8x32xf32, #tpu.memory_space<vmem>>, vector<1x2x8x32xf32>
      %185 = vector.shape_cast %184 : vector<1x2x8x32xf32> to vector<2x8x32xf32>
      %186 = vector.shape_cast %183 : vector<2x8x32xf32> to vector<1x2x8x32xf32>
      tpu.vector_store %arg15[%c0_75, %c0_76, %c0_77, %c0_78], %186 {strides = array<i32>} : memref<1x2x8x32xf32, #tpu.memory_space<vmem>>, vector<1x2x8x32xf32>,
    } else {
    }
    return
  }
  func.func @transform_0(%arg0: i32, %arg1: i32) -> (i32, i32, i32, i32) {
    %c0_i32 = arith.constant 0 : i32
    %c0_i32_0 = arith.constant 0 : i32
    %c0_i32_1 = arith.constant 0 : i32
    %c0_i32_2 = arith.constant 0 : i32
    return %arg0, %c0_i32, %c0_i32_0, %c0_i32_1 : i32, i32, i32, i32
  }
  func.func @transform_1(%arg0: i32, %arg1: i32) -> (i32, i32, i32) {
    %c0_i32 = arith.constant 0 : i32
    %c0_i32_0 = arith.constant 0 : i32
    %c0_i32_1 = arith.constant 0 : i32
    return %arg1, %c0_i32, %c0_i32_0 : i32, i32, i32
  }
  func.func @transform_2(%arg0: i32, %arg1: i32) -> (i32, i32, i32) {
    %c0_i32 = arith.constant 0 : i32
    %c0_i32_0 = arith.constant 0 : i32
    %c0_i32_1 = arith.constant 0 : i32
    return %arg1, %c0_i32, %c0_i32_0 : i32, i32, i32
  }
  func.func @transform_3(%arg0: i32, %arg1: i32) -> (i32, i32, i32) {
    %c0_i32 = arith.constant 0 : i32
    %c0_i32_0 = arith.constant 0 : i32
    %c0_i32_1 = arith.constant 0 : i32
    return %arg1, %c0_i32, %c0_i32_0 : i32, i32, i32
  }
  func.func @transform_4(%arg0: i32, %arg1: i32) -> (i32, i32, i32) {
    %c0_i32 = arith.constant 0 : i32
    %c0_i32_0 = arith.constant 0 : i32
    %c0_i32_1 = arith.constant 0 : i32
    return %arg1, %c0_i32, %c0_i32_0 : i32, i32, i32
  }
  func.func @transform_5(%arg0: i32, %arg1: i32) -> (i32, i32, i32) {
    %c0_i32 = arith.constant 0 : i32
    %c0_i32_0 = arith.constant 0 : i32
    %c0_i32_1 = arith.constant 0 : i32
    return %arg1, %c0_i32, %c0_i32_0 : i32, i32, i32
  }
  func.func @transform_6(%arg0: i32, %arg1: i32) -> (i32, i32, i32) {
    %c0_i32 = arith.constant 0 : i32
    %c0_i32_0 = arith.constant 0 : i32
    %c0_i32_1 = arith.constant 0 : i32
    return %arg1, %c0_i32, %c0_i32_0 : i32, i32, i32
  }
  func.func @transform_7(%arg0: i32, %arg1: i32) -> (i32, i32, i32) {
    %c0_i32 = arith.constant 0 : i32
    %c0_i32_0 = arith.constant 0 : i32
    %c0_i32_1 = arith.constant 0 : i32
    return %arg1, %c0_i32, %c0_i32_0 : i32, i32, i32
  }
  func.func @transform_8(%arg0: i32, %arg1: i32) -> (i32, i32, i32) {
    %c0_i32 = arith.constant 0 : i32
    %c0_i32_0 = arith.constant 0 : i32
    %c0_i32_1 = arith.constant 0 : i32
    return %arg1, %c0_i32, %c0_i32_0 : i32, i32, i32
  }
  func.func @transform_9(%arg0: i32, %arg1: i32) -> (i32, i32, i32) {
    %c0_i32 = arith.constant 0 : i32
    %c0_i32_0 = arith.constant 0 : i32
    %c0_i32_1 = arith.constant 0 : i32
    return %arg1, %c0_i32, %c0_i32_0 : i32, i32, i32
  }
  func.func @transform_10(%arg0: i32, %arg1: i32) -> (i32, i32, i32) {
    %c0_i32 = arith.constant 0 : i32
    %c0_i32_0 = arith.constant 0 : i32
    %c0_i32_1 = arith.constant 0 : i32
    return %arg1, %c0_i32, %c0_i32_0 : i32, i32, i32
  }
  func.func @transform_11(%arg0: i32, %arg1: i32) -> (i32, i32, i32) {
    %c0_i32 = arith.constant 0 : i32
    %c0_i32_0 = arith.constant 0 : i32
    %c0_i32_1 = arith.constant 0 : i32
    return %arg1, %c0_i32, %c0_i32_0 : i32, i32, i32
  }
  func.func @transform_12(%arg0: i32, %arg1: i32) -> (i32, i32, i32) {
    %c0_i32 = arith.constant 0 : i32
    %c0_i32_0 = arith.constant 0 : i32
    %c0_i32_1 = arith.constant 0 : i32
    return %arg1, %c0_i32, %c0_i32_0 : i32, i32, i32
  }
  func.func @transform_13(%arg0: i32, %arg1: i32) -> (i32, i32, i32, i32) {
    %c0_i32 = arith.constant 0 : i32
    %c0_i32_0 = arith.constant 0 : i32
    %c0_i32_1 = arith.constant 0 : i32
    %c0_i32_2 = arith.constant 0 : i32
    return %arg0, %c0_i32, %c0_i32_0, %c0_i32_1 : i32, i32, i32, i32
  }
}

</mosaic_0001>

<bundles_post_ra>
// kernel: tpu_custom_call.1
= control target key start
LH: loop header
LB: loop body
LE: loop exit
PB: predicated region body
PF: predicated region fallthrough
CT: control target
= control target key end

     0   :  { %s5071_s0 = inlined_call_operand.vmem [shape: f32[2,2,8,32], index: 0, kind: input, shape index: {}]   ;;  %s5072_s1 = inlined_call_operand.vmem [shape: f32[2,32,96], index: 1, kind: input, shape index: {}]   ;;  %s5073_s2 = inlined_call_operand.vmem [shape: f32[2,1,96], index: 2, kind: input, shape index: {}]   ;;  %s5074_s3 = inlined_call_operand.vmem [shape: f32[2,32,32], index: 3, kind: input, shape index: {}]   ;;  %s5075_s4 = inlined_call_operand.vmem [shape: f32[2,1,32], index: 4, kind: input, shape index: {}]   ;;  %s5076_s5 = inlined_call_operand.vmem [shape: f32[2,32,1024], index: 5, kind: input, shape index: {}]   ;;  %s5077_s6 = inlined_call_operand.vmem [shape: f32[2,1,1024], index: 6, kind: input, shape index: {}]   ;;  %s5078_s7 = inlined_call_operand.vmem [shape: f32[2,1024,32], index: 7, kind: input, shape index: {}]   ;;  %s5079_s8 = inlined_call_operand.vmem [shape: f32[2,1,32], index: 8, kind: input, shape index: {}]   ;;  %s5080_s9 = inlined_call_operand.vmem [shape: f32[2,1,32], index: 9, kind: input, shape index: {}]   ;;  %s5081_s10 = inlined_call_operand.vmem [shape: f32[2,1,32], index: 10, kind: input, shape index: {}]   ;;  %s5082_s11 = inlined_call_operand.vmem [shape: f32[2,1,32], index: 11, kind: input, shape index: {}]   ;;  %s5083_s12 = inlined_call_operand.vmem [shape: f32[2,1,32], index: 12, kind: input, shape index: {}]   ;;  %s5084_s13 = inlined_call_operand.hbm [shape: f32[2,2,8,32], index: 13, kind: output, shape index: {}]  }
   0x1   :  { %5100 = sst [smem:[#allocation19_spill]] %s5071_s0 }
   0x2   :  { %5101 = sst [smem:[#allocation20_spill]] %s5072_s1 }
   0x3   :  { %5102 = sst [smem:[#allocation21_spill]] %s5074_s3 }
   0x4   :  { %5103 = sst [smem:[#allocation22_spill]] %s5076_s5 }
   0x5   :  { %5104 = sst [smem:[#allocation23_spill]] %s5077_s6 }
   0x6   :  { %5105 = sst [smem:[#allocation24_spill]] %s5079_s8 }
   0x7   :  { %5106 = sst [smem:[#allocation25_spill]] %s5083_s12 }
   0x8   :  { %5107 = sst [smem:[#allocation26_spill]] %s5084_s13 }
   0x9   :  { %18 = vsyncpa [#allocation4], 0 }
   0xa   :  { %20 = vsyncpa [#allocation4 + $0x1], 0  ;;  %s4434_s25 = smov 0   ;;  %s4436_s26 = smov 0  }
   0xb   :  { %s4438_s27 = smov 0   ;;  %s4440_s28 = smov 0  }
   0xc   :  { %s4442_s29 = smov 0   ;;  %s4444_s30 = smov 0  }
   0xd   :  { %s4446_s14 = smov 0   ;;  %s4448_s15 = smov 0  }
   0xe LB: > { %5108 = sst [smem:[#allocation6_spill]] %s4318_s25  ;;  %s3560_s16 = sadd.s32 4294967295, %s4346_s15   ;;  %s4346_s15 = sphi %s4448_s15, %s26_s15   ;;  %s4342_s14 = sphi %s4446_s14, %s5151_s14   ;;  %s4338_s30 = sphi %s4444_s30, %s5150_s30   ;;  %s4334_s29 = sphi %s4442_s29, %s5149_s29   ;;  %s4330_s28 = sphi %s4440_s28, %s5148_s28   ;;  %s4326_s27 = sphi %s4438_s27, %s5147_s27   ;;  %s4322_s26 = sphi %s4436_s26, %s5146_s26   ;;  %s4318_s25 = sphi %s4434_s25, %s5145_s25  }
   0xf   : > { %5109 = sst [smem:[#allocation7_spill]] %s4322_s26  ;;  %s3561_s17 = sadd.s32 4294967294, %s4346_s15  }
  0x10   : > { %5110 = sst [smem:[#allocation8_spill]] %s4326_s27  ;;  %s35_s18 = sadd.s32 1, %s4338_s30 }
  0x11   : > { %5111 = sst [smem:[#allocation9_spill]] %s4330_s28  ;;  %p36_p0 = scmp.ge.s32.totalorder %s35_s18, 2 }
  0x12   : > { %5112 = sst [smem:[#allocation10_spill]] %s4334_s29  ;;  %s38_s19 = sadd.s32 1, %s4342_s14 }
  0x13   : > { %5113 = sst [smem:[#allocation11_spill]] %s4338_s30  ;;  %p393_p1 = scmp.ne.s32.totalorder %s4326_s27, %s4322_s26 }
  0x14   : > { %5114 = sst [smem:[#allocation12_spill]] %s4342_s14  ;;  %p394_p2 = scmp.eq.s32.totalorder %s3560_s16, 3 }
  0x15   : > { %5115 = sst [smem:[#allocation13_spill]] %s4346_s15  ;;  %s5153_s18 = smov (%p36_p0, %s35_s18), 0 }
  0x16   : > { %5116 = sst [smem:[#allocation14_spill]] %s5153_s18  ;;  %s5155_s19 = smov (!%p36_p0, %s38_s19), %s4342_s14 }
  0x17   : > { %p4483_p3 = por %p394_p2, %p393_p1  ;;  %p399_p4 = scmp.ne.s32.totalorder %s4322_s26, %s4318_s25 }
  0x18   : > { %p40_p5 = scmp.ge.s32.totalorder %s5155_s19, 2  ;;  %p400_p6 = scmp.eq.s32.totalorder %s3561_s17, 3 }
  0x19   : > { %s5117_s20 = scalar_select %p4483_p3, 1, 0 }
  0x1a   : > { %p3564_p7 = scmp.ge.s32.totalorder %s4346_s15, 1  ;;  %p507_p8 = scmp.lt.s32.totalorder %s4346_s15, 5 }
  0x1b   : > { %5118 = sst [smem:[#allocation15_spill]] %s5117_s20  ;;  %s5157_s19 = smov (%p40_p5, %s5155_s19), 0 }
  0x1c   : > { %5119 = sst [smem:[#allocation16_spill]] %s5157_s19  ;;  %p4493_p9 = por %p400_p6, %p399_p4 }
  0x1d   : > { %p508_p10 = pnand %p3564_p7, %p507_p8  ;;  %s380_s22 = ssub.s32 %s4342_s14, %s5157_s19 }
  0x1e   : > { %s5120_s21 = scalar_select %p4493_p9, 1, 0 }
  0x1f   : > { %s383_s23 = sadd.s32 1, %s4326_s27  ;;  %p381_p11 = scmp.eq.s32.totalorder %s380_s22, 0 }
  0x20   : > { %5121 = sst [smem:[#allocation17_spill]] %s5120_s21  ;;  %511 = sbr.rel (%p508_p10) target bundleno = 4304 (0x10d0), region = 72 }
  0x21   : > { %s4501_s24 = scalar_select %p381_p11, %s4326_s27, %s383_s23  }
  0x22   : > { %s5088_s16 = sand.u32 (!%p508_p10), 1, %s4322_s26   ;;  %p596_p12 = scmp.lt.s32.totalorder (!%p508_p10), %s4334_s29, 1 }
  0x23   : > { %5122 = sst [smem:[#allocation18_spill]] %s4501_s24  ;;  %s3565_s17 = sshll.u32 (!%p508_p10), %s5088_s16, 4 }
  0x24   : > { %p601_p13 = scmp.lt.s32.totalorder (!%p508_p10), %s4330_s28, 1  ;;  %s5123_s0 = sld [smem:[#allocation19_spill]] (!%p508_p10) }
  0x25   : > { %s5124_s1 = sld [smem:[#allocation20_spill]] (!%p508_p10)  ;;  %s5125_s3 = sld [smem:[#allocation21_spill]] (!%p508_p10) }
  0x26   : > { %s5126_s5 = sld [smem:[#allocation22_spill]] (!%p508_p10)  ;;  %s5127_s6 = sld [smem:[#allocation23_spill]] (!%p508_p10) }
  0x27   : > { %s597_s18 = scalar_select %p596_p12, %s4334_s29, 1 }
  0x28   : > { %s4510_s30 = scalar_select %p601_p13, %s4330_s28, 1 }
  0x29   : > { %s3633_s22 = sshll.u32 %s597_s18, 4  ;;  %s5129_s20 = sld [smem:[#allocation25_spill]] }
  0x2a   : > { %s600_s14 = scalar_lea.vmem %s5123_s0, %s3633_s22  ;;  %s3634_s16 = sshll.u32 %s4510_s30, 5 }
  0x2b   : > { %s605_s21 = scalar_lea.vmem %s5124_s1, %s3634_s16  ;;  %s4526_s29 = scalar_lea.vmem %s5125_s3, %s3634_s16 }
  0x2c   : > { %s3636_s22 = sshll.u32 %s4510_s30, 8  ;;  %s3574_s23 = sshll.u32 %s4510_s30, 3 }
  0x2d   : > { %s4537_s27 = scalar_lea.vmem %s5126_s5, %s3636_s22  ;;  %s4542_s25 = scalar_lea.vmem %s5127_s6, %s3574_s23 }
  0x2e   : > { %s3637_s15 = sshll.u32 %s4510_s30, 10  ;;  %s636_s0 = scalar_lea.vmem %s5080_s9, %s4510_s30 }
  0x2f   : > { %s4552_s18 = scalar_lea.vmem %s5078_s7, %s3637_s15  ;;  %s639_s1 = scalar_lea.vmem %s5081_s10, %s4510_s30 }
  0x30   : > { %s642_s5 = scalar_lea.vmem %s5082_s11, %s4510_s30  ;;  %s645_s16 = scalar_lea.vmem %s5129_s20, %s4510_s30 }
  0x31   : > { %s4570_s8 = scalar_lea.vmem [#allocation3], %s3565_s17  ;;  %s5130_s13 = sld [smem:[#allocation9_spill]] }
  0x37   : > { %p3577_p0 = scmp.ne.s32.totalorder %s5130_s13, 0 }
  0x38   : > { %v650_v0 = vld [vmem:[%s600_s14] sm:$0xff] (!%p3577_p0)  ;;  %vm652_vm0 = vcmask (!%p3577_p0), 261120   ;;  %v651_v1 = vld [vmem:[%s600_s14 + $0x8] sm:$0xff] (!%p3577_p0) }
  0x39   : > { %649 = sbr.rel (%p3577_p0) target bundleno = 64 (0x40), region = 76  ;;  %653 = vst.msk [vmem:[#allocation2] sm:$0xff] (!%p3577_p0), %vm652_vm0, %v650_v0  ;;  %654 = vst.msk [vmem:[#allocation2 + $0x8] sm:$0xff] (!%p3577_p0), %vm652_vm0, %v651_v1 }
  0x40 PF: > { %v657_v2 = vld [vmem:[%s605_s21] sm:$0xff]  ;;  %v658_v3 = vld [vmem:[%s605_s21 + $0x8] sm:$0xff]  ;;  %v659_v4 = vld [vmem:[%s605_s21 + $0x10] sm:$0xff]  ;;  %vm668_vm1 = vcmask 261120   ;;  %v4348_v10 = vmov 0.0   ;;  %vm4349_vm2 = vmmov 0   ;;  %s5131_s14 = scalar_lea.vmem %s5073_s2, %s4510_s30  ;;  %s5132_s3 = scalar_lea.vmem %s5075_s4, %s4510_s30 }
  0x41   : > { %v3952_v5 = vpack.c.bf16 %v658_v3, %v657_v2  ;;  %v660_v6 = vld [vmem:[%s605_s21 + $0x18] sm:$0xff]  ;;  %v4573_v7 = vld [vmem:[#allocation2] sm:$0xff]  ;;  %v4577_v9 = vld [vmem:[#allocation2 + $0x8] sm:$0xff]  ;;  %3852 = vmatprep.subr.mxu1 %v4348_v10  ;;  %3854 = vmatprep.mubr.msk.f32.mxu1 %vm4349_vm2, %v4348_v10  ;;  %s4350_s21 = smov 96   ;;  %vm757_vm3 = vcmask 64512   ;;  %s4351_s17 = smov 64  }
  0x42   : > { %v3956_v8 = vpack.c.bf16 %v660_v6, %v659_v4  ;;  %3849 = vmatprep.mubr.msk.f32.mxu0 %vm668_vm1, %v4573_v7  ;;  %v3578_v11 = vld [vmem:[%s5131_s14] ss:$0 sm:$0xff]  ;;  %s4352_s19 = smov 88   ;;  %s4353_s15 = smov 120  }
  0x43   : > { %3953 = vmatprep.subr.bf16.mxu0 %v3952_v5  ;;  %s4354_s28 = smov 56   ;;  %s4355_s12 = smov 112  }
  0x44   : > { %3955 = vmatpush3.bf16.msra.mxu0 %v3952_v5  ;;  %s4356_s22 = smov 80   ;;  %s4357_s23 = smov 48  }
  0x45   : > { %3957 = vmatprep.subr.bf16.mxu0 %v3956_v8  ;;  %s4358_s24 = smov 72   ;;  %s4359_s26 = smov 104  }
  0x46   : > { %s4360_s20 = smov 40  }
  0x48   : > { %3959 = vmatpush3.bf16.msra.mxu0 %v3956_v8 }
  0x49   : > { %3872 = vmatprep.subr.mxu0 %v4348_v10 }
  0x4b   : > { %3850 = vmatmul.mubr.msk.f32.vlgmr.msra.gmra.mrb[0].mxu0 %vm668_vm1, %v4577_v9 }
  0x4c   : > { %3874 = vmatprep.mubr.msk.f32.mxu0 %vm4349_vm2, %v4348_v10 }
 0x11e   : > { %v3851_v12 = vpop.f32.mrb[0].mxu0 }
 0x11f   : > { %v741_v13 = vpop.f32.mrb[1].mxu0  ;;  %v4595_v15 = vadd.f32 %v3851_v12, %v3578_v11 }
 0x120   : > { %v4592_v14 = vadd.f32 %v3578_v11, %v741_v13 }
 0x122   : > { %755 = vrot.lane.b32.xlu0 %v4592_v14, %s4350_s21 }
 0x126   : > { %833 = vrot.lane.b32.xlu0 %v4595_v15, %s4350_s21 }
 0x194   : > { %v756_v16 = vpop.permute.xlu0 %755 }
 0x195   : > { %3853 = vmatpush3.xpose.msk.msra.mxu1 %vm757_vm3, %v756_v16 }
 0x196   : > { %3857 = vmatprep.subr.mxu1 %v4348_v10 }
 0x198   : > { %3855 = vmatmul.mubr.msk.f32.vlgmr.msra.gmra.mrb[0].mxu1 %vm757_vm3, %v4592_v14  ;;  %v834_v17 = vpop.permute.xlu0 %833 }
 0x199   : > { %3858 = vmatpush3.xpose.msk.msra.mxu1 %vm757_vm3, %v834_v17  ;;  %3859 = vmatprep.mubr.msk.f32.mxu1 %vm4349_vm2, %v4348_v10 }
 0x19a   : > { %3862 = vmatprep.subr.mxu1 %v4348_v10 }
 0x19c   : > { %3860 = vmatmul.mubr.msk.f32.vlgmr.msra.gmra.mrb[2].mxu1 %vm757_vm3, %v4595_v15 }
 0x19d   : > { %3864 = vmatprep.mubr.msk.f32.mxu1 %vm4349_vm2, %v4348_v10 }
 0x26b   : > { %v828_v18 = vpop.f32.mrb[0].mxu1 }
 0x26c   : > { %v3856_v19 = vpop.f32.mrb[1].mxu1  ;;  %v909_v20 = vsel %vm757_vm3, %v828_v18, -inf }
 0x26d   : > { %910 = vmax.xlane.f32.xlu1 %v909_v20  ;;  %v751_v20 = vld [vmem:[%s4526_s29 + $0x8] sm:$0xff] }
 0x26f   : > { %v905_v21 = vpop.f32.mrb[2].mxu1 }
 0x270   : > { %v3861_v22 = vpop.f32.mrb[3].mxu1  ;;  %v912_v23 = vsel %vm757_vm3, %v905_v21, -inf }
 0x271   : > { %913 = vmax.xlane.f32.xlu1 %v912_v23 }
 0x282   : > { %931 = vrot.lane.b32.xlu1 %v4592_v14, %s4351_s17 }
 0x286   : > { %1007 = vrot.lane.b32.xlu1 %v4595_v15, %s4351_s17 }
 0x28a   : > { %1163 = vrot.lane.b32.xlu1 %v4595_v15, %s4352_s19 }
 0x2fa   : > { %v911_v24 = vpop.xlane.xlu1 %910 }
 0x2fb   : > { %v915_v25 = vsub.f32 %v828_v18, %v911_v24 }
 0x2fd   : > { %v917_v26 = vmul.f32 1.442695, %v915_v25 }
 0x2fe   : > { %v914_v27 = vpop.xlane.xlu1 %913 }
 0x2ff   : > { %4212 = vpow2.f32 %v917_v26  ;;  %v916_v28 = vsub.f32 %v905_v21, %v914_v27  ;;  %v750_v21 = vld [vmem:[%s4526_s29] sm:$0xff] }
 0x301   : > { %v919_v29 = vmul.f32 1.442695, %v916_v28 }
 0x302   : > { %v932_v30 = vpop.permute.xlu1 %931 }
 0x303   : > { %4214 = vpow2.f32 %v919_v29  ;;  %3863 = vmatpush3.msra.mxu1 %v932_v30 }
 0x304   : > { %3867 = vmatprep.subr.mxu1 %v4348_v10 }
 0x306   : > { %v1008_v35 = vpop.permute.xlu1 %1007 }
 0x309   : > { %v4213_v31 = vpop.eup %4212 }
 0x30a   : > { %v921_v32 = vsel %vm757_vm3, %v4213_v31, 0.0  ;;  %v1164_v36 = vpop.permute.xlu1 %1163 }
 0x30b   : > { %922 = vadd.xlane.f32.xlu0 %v921_v32 }
 0x30d   : > { %v4215_v33 = vpop.eup %4214 }
 0x30e   : > { %v924_v34 = vsel %vm757_vm3, %v4215_v33, 0.0 }
 0x30f   : > { %925 = vadd.xlane.f32.xlu1 %v924_v34 }
 0x320   : > { %1161 = vrot.lane.b32.xlu1 %v4595_v15, %s4353_s15 }
 0x321   : > { %1085 = vrot.lane.b32.xlu0 %v4592_v14, %s4352_s19 }
 0x324   : > { %1083 = vrot.lane.b32.xlu1 %v4592_v14, %s4353_s15 }
 0x398   : > { %v923_v37 = vpop.xlane.xlu0 %922 }
 0x399   : > { %4216 = vrcp.f32 %v923_v37 }
 0x39c   : > { %v926_v38 = vpop.xlane.xlu1 %925  ;;  %v1086_v39 = vpop.permute.xlu0 %1085 }
 0x39d   : > { %4218 = vrcp.f32 %v926_v38  ;;  %3873 = vmatpush3.xpose.msk.msra.mxu0 %vm757_vm3, %v1086_v39 }
 0x39e   : > { %3882 = vmatprep.subr.mxu0 %v4348_v10 }
 0x3a0   : > { %v1162_v40 = vpop.permute.xlu1 %1161 }
 0x3a3   : > { %v4217_v41 = vpop.eup %4216 }
 0x3a4   : > { %v929_v42 = vmul.f32 %v4217_v41, %v4213_v31  ;;  %v1084_v43 = vpop.permute.xlu1 %1083 }
 0x3a5   : > { %3875 = vmatmul.mubr.msk.f32.vlgmr.msra.gmra.mrb[2].mxu0 %vm757_vm3, %v1084_v43 }
 0x3a6   : > { %3865 = vmatmul.mubr.msk.f32.vlgmr.msra.gmra.mrb[4].mxu1 %vm757_vm3, %v929_v42  ;;  %3884 = vmatprep.mubr.msk.f32.mxu0 %vm4349_vm2, %v4348_v10 }
 0x3a7   : > { %v4219_v44 = vpop.eup %4218  ;;  %3868 = vmatpush3.msra.mxu1 %v1008_v35  ;;  %3869 = vmatprep.mubr.msk.f32.mxu1 %vm4349_vm2, %v4348_v10 }
 0x3a8   : > { %v930_v45 = vmul.f32 %v4219_v44, %v4215_v33  ;;  %3877 = vmatprep.subr.mxu1 %v4348_v10  ;;  %v752_v44 = vld [vmem:[%s4526_s29 + $0x10] sm:$0xff] }
 0x3aa   : > { %3870 = vmatmul.mubr.msk.f32.vlgmr.msra.gmra.mrb[6].mxu1 %vm757_vm3, %v930_v45 }
 0x3ab   : > { %3879 = vmatprep.mubr.msk.f32.mxu1 %vm4349_vm2, %v4348_v10 }
 0x3ae   : > { %3878 = vmatpush3.xpose.msk.msra.mxu1 %vm757_vm3, %v1164_v36 }
 0x3af   : > { %3887 = vmatprep.subr.mxu1 %v4348_v10 }
 0x3b1   : > { %3880 = vmatmul.mubr.msk.f32.vlgmr.msra.gmra.mrb[8].mxu1 %vm757_vm3, %v1162_v40 }
 0x3b2   : > { %3889 = vmatprep.mubr.msk.f32.mxu1 %vm4349_vm2, %v4348_v10 }
 0x478   : > { %v1157_v46 = vpop.f32.mrb[2].mxu0 }
 0x479   : > { %v4638_v47 = vpop.f32.mrb[4].mxu1  ;;  %v3876_v48 = vpop.f32.mrb[3].mxu0  ;;  %v1239_v55 = vsel %vm757_vm3, %v1157_v46, -inf }
 0x47a   : > { %v3866_v49 = vpop.f32.mrb[5].mxu1 }
 0x47d   : > { %v4640_v50 = vpop.f32.mrb[6].mxu1 }
 0x47e   : > { %v3871_v51 = vpop.f32.mrb[7].mxu1 }
 0x484   : > { %v1235_v52 = vpop.f32.mrb[8].mxu1 }
 0x485   : > { %v3881_v53 = vpop.f32.mrb[9].mxu1  ;;  %v1242_v54 = vsel %vm757_vm3, %v1235_v52, -inf }
 0x486   : > { %1243 = vmax.xlane.f32.xlu1 %v1242_v54 }
 0x497   : > { %1337 = vrot.lane.b32.xlu1 %v4595_v15, %s4354_s28 }
 0x49b   : > { %1575 = vrot.lane.b32.xlu1 %v4592_v14, %s4355_s12 }
 0x49f   : > { %1655 = vrot.lane.b32.xlu1 %v4595_v15, %s4356_s22 }
 0x4a3   : > { %1653 = vrot.lane.b32.xlu1 %v4595_v15, %s4355_s12 }
 0x4c7   : > { %1240 = vmax.xlane.f32.xlu1 %v1239_v55 }
 0x513   : > { %v1244_v56 = vpop.xlane.xlu1 %1243 }
 0x514   : > { %v1246_v57 = vsub.f32 %v1235_v52, %v1244_v56 }
 0x516   : > { %v1249_v58 = vmul.f32 1.442695, %v1246_v57 }
 0x517   : > { %v1338_v59 = vpop.permute.xlu1 %1337 }
 0x518   : > { %4220 = vpow2.f32 %v1249_v58  ;;  %3888 = vmatpush3.msra.mxu1 %v1338_v59 }
 0x519   : > { %3902 = vmatprep.subr.mxu1 %v4348_v10 }
 0x51b   : > { %v1576_v62 = vpop.permute.xlu1 %1575 }
 0x51f   : > { %v1656_v63 = vpop.permute.xlu1 %1655 }
 0x522   : > { %v4221_v60 = vpop.eup %4220 }
 0x523   : > { %v1254_v61 = vsel %vm757_vm3, %v4221_v60, 0.0  ;;  %v1654_v0 = vpop.permute.xlu1 %1653 }
 0x524   : > { %1255 = vadd.xlane.f32.xlu0 %v1254_v61 }
 0x53a   : > { %1577 = vrot.lane.b32.xlu0 %v4592_v14, %s4356_s22  ;;  %s5136_s22 = sld [smem:[#allocation9_spill]] }
 0x540   : > { %p3627_p1 = scmp.ne.s32.totalorder %s5136_s22, 1 }
 0x554   : > { %v1241_v1 = vpop.xlane.xlu1 %1240 }
 0x555   : > { %v1245_v2 = vsub.f32 %v1157_v46, %v1241_v1 }
 0x557   : > { %v1247_v3 = vmul.f32 1.442695, %v1245_v2 }
 0x559   : > { %4222 = vpow2.f32 %v1247_v3 }
 0x563   : > { %v4223_v4 = vpop.eup %4222 }
 0x564   : > { %v1251_v5 = vsel %vm757_vm3, %v4223_v4, 0.0 }
 0x565   : > { %1252 = vadd.xlane.f32.xlu0 %v1251_v5 }
 0x57b   : > { %1261 = vrot.lane.b32.xlu0 %v4592_v14, %s4354_s28 }
 0x57f   : > { %1829 = vrot.lane.b32.xlu0 %v4595_v15, %s4357_s23 }
 0x583   : > { %1990 = vrot.lane.b32.xlu0 %v4592_v14, %s4358_s24 }
 0x587   : > { %2068 = vrot.lane.b32.xlu0 %v4595_v15, %s4358_s24 }
 0x58b   : > { %1988 = vrot.lane.b32.xlu0 %v4592_v14, %s4359_s26 }
 0x5b1   : > { %v1256_v6 = vpop.xlane.xlu0 %1255 }
 0x5b2   : > { %4224 = vrcp.f32 %v1256_v6 }
 0x5b5   : > { %v1578_v12 = vpop.permute.xlu0 %1577 }
 0x5bc   : > { %v4225_v8 = vpop.eup %4224 }
 0x5bd   : > { %v1260_v11 = vmul.f32 %v4225_v8, %v4221_v60 }
 0x5bf   : > { %3890 = vmatmul.mubr.msk.f32.vlgmr.msra.gmra.mrb[10].mxu1 %vm757_vm3, %v1260_v11 }
 0x5c0   : > { %3903 = vmatpush3.xpose.msk.msra.mxu1 %vm757_vm3, %v1578_v12  ;;  %3904 = vmatprep.mubr.msk.f32.mxu1 %vm4349_vm2, %v4348_v10 }
 0x5c1   : > { %3907 = vmatprep.subr.mxu1 %v4348_v10 }
 0x5c3   : > { %3905 = vmatmul.mubr.msk.f32.vlgmr.msra.gmra.mrb[12].mxu1 %vm757_vm3, %v1576_v62 }
 0x5c4   : > { %3908 = vmatpush3.xpose.msk.msra.mxu1 %vm757_vm3, %v1656_v63  ;;  %3909 = vmatprep.mubr.msk.f32.mxu1 %vm4349_vm2, %v4348_v10 }
 0x5c5   : > { %3917 = vmatprep.subr.mxu1 %v4348_v10 }
 0x5c7   : > { %3910 = vmatmul.mubr.msk.f32.vlgmr.msra.gmra.mrb[14].mxu1 %vm757_vm3, %v1654_v0 }
 0x5c8   : > { %3919 = vmatprep.mubr.msk.f32.mxu1 %vm4349_vm2, %v4348_v10 }
 0x5f2   : > { %v1253_v13 = vpop.xlane.xlu0 %1252 }
 0x5f3   : > { %4226 = vrcp.f32 %v1253_v13 }
 0x5f6   : > { %v1262_v16 = vpop.permute.xlu0 %1261 }
 0x5f7   : > { %3883 = vmatpush3.msra.mxu0 %v1262_v16 }
 0x5f8   : > { %3892 = vmatprep.subr.mxu0 %v751_v20 }
 0x5fa   : > { %v1830_v17 = vpop.permute.xlu0 %1829 }
 0x5fb   : > { %3918 = vmatpush3.msra.mxu1 %v1830_v17 }
 0x5fc   : > { %3927 = vmatprep.subr.mxu1 %v4348_v10 }
 0x5fd   : > { %v4227_v18 = vpop.eup %4226 }
 0x5fe   : > { %v1259_v19 = vmul.f32 %v4227_v18, %v4223_v4  ;;  %v1991_v46 = vpop.permute.xlu0 %1990 }
 0x600   : > { %3885 = vmatmul.mubr.msk.f32.vlgmr.msra.gmra.mrb[4].mxu0 %vm757_vm3, %v1259_v19  ;;  %v753_v19 = vld [vmem:[%s4526_s29 + $0x18] sm:$0xff] }
 0x601   : > { %3893 = vmatpush3.msra.mxu0 %v751_v20 }
 0x602   : > { %3897 = vmatprep.subr.mxu0 %v750_v21 }
 0x692   : > { %v1409_v22 = vpop.f32.mrb[10].mxu1 }
 0x693   : > { %v3891_v23 = vpop.f32.mrb[11].mxu1 }
 0x696   : > { %v1649_v24 = vpop.f32.mrb[12].mxu1 }
 0x697   : > { %v3906_v25 = vpop.f32.mrb[13].mxu1  ;;  %v1731_v26 = vsel %vm757_vm3, %v1649_v24, -inf }
 0x698   : > { %1732 = vmax.xlane.f32.xlu1 %v1731_v26 }
 0x69a   : > { %v1727_v27 = vpop.f32.mrb[14].mxu1 }
 0x69b   : > { %v3911_v28 = vpop.f32.mrb[15].mxu1  ;;  %v1734_v29 = vsel %vm757_vm3, %v1727_v27, -inf }
 0x69c   : > { %1735 = vmax.xlane.f32.xlu1 %v1734_v29 }
 0x6d3   : > { %v1333_v30 = vpop.f32.mrb[4].mxu0 }
 0x6d4   : > { %v3886_v31 = vpop.f32.mrb[5].mxu0  ;;  %3894 = vmatprep.mubr.msk.f32.mxu0 %vm757_vm3, %v1333_v30 }
 0x6d5   : > { %3895 = vmatmul.mubr.msk.f32.vlgmr.msra.gmra.mrb[6].mxu0 %vm757_vm3, %v1409_v22 }
 0x6d6   : > { %3899 = vmatprep.mubr.msk.f32.mxu0 %vm757_vm3, %v4638_v47  ;;  %3898 = vmatpush3.msra.mxu0 %v750_v21 }
 0x6d7   : > { %3912 = vmatprep.subr.mxu0 %v4348_v10 }
 0x6dd   : > { %3900 = vmatmul.mubr.msk.f32.vlgmr.msra.gmra.mrb[6].mxu0 %vm757_vm3, %v4640_v50  ;;  %v2069_v50 = vpop.permute.xlu0 %2068 }
 0x6de   : > { %3914 = vmatprep.mubr.msk.f32.mxu0 %vm4349_vm2, %v4348_v10 }
 0x6e1   : > { %v1989_v52 = vpop.permute.xlu0 %1988 }
 0x725   : > { %v1733_v32 = vpop.xlane.xlu1 %1732 }
 0x726   : > { %v1737_v33 = vsub.f32 %v1649_v24, %v1733_v32 }
 0x728   : > { %v1739_v34 = vmul.f32 1.442695, %v1737_v33 }
 0x729   : > { %v1736_v35 = vpop.xlane.xlu1 %1735 }
 0x72a   : > { %4228 = vpow2.f32 %v1739_v34  ;;  %v1738_v36 = vsub.f32 %v1727_v27, %v1736_v35 }
 0x72c   : > { %v1741_v37 = vmul.f32 1.442695, %v1738_v36 }
 0x72e   : > { %4230 = vpow2.f32 %v1741_v37 }
 0x734   : > { %v4229_v38 = vpop.eup %4228 }
 0x735   : > { %v1743_v39 = vsel %vm757_vm3, %v4229_v38, 0.0 }
 0x736   : > { %1744 = vadd.xlane.f32.xlu1 %v1743_v39 }
 0x738   : > { %v4231_v40 = vpop.eup %4230 }
 0x739   : > { %v1746_v41 = vsel %vm757_vm3, %v4231_v40, 0.0 }
 0x73a   : > { %1747 = vadd.xlane.f32.xlu1 %v1746_v41 }
 0x74b   : > { %1753 = vrot.lane.b32.xlu1 %v4592_v14, %s4357_s23 }
 0x74f   : > { %2066 = vrot.lane.b32.xlu1 %v4595_v15, %s4359_s26 }
 0x7c3   : > { %v1745_v42 = vpop.xlane.xlu1 %1744 }
 0x7c4   : > { %4232 = vrcp.f32 %v1745_v42 }
 0x7c7   : > { %v1748_v43 = vpop.xlane.xlu1 %1747 }
 0x7c8   : > { %4234 = vrcp.f32 %v1748_v43  ;;  %v2458_v43 = vld [vmem:[%s4537_s27 + $0x8] sm:$0xff] }
 0x7cb   : > { %v1754_v45 = vpop.permute.xlu1 %1753 }
 0x7cc   : > { %3913 = vmatpush3.msra.mxu0 %v1754_v45  ;;  %v2460_v45 = vld [vmem:[%s4537_s27 + $0x18] sm:$0xff] }
 0x7cd   : > { %3922 = vmatprep.subr.mxu0 %v752_v44 }
 0x7ce   : > { %v4233_v47 = vpop.eup %4232 }
 0x7cf   : > { %v1751_v48 = vmul.f32 %v4233_v47, %v4229_v38  ;;  %v2067_v57 = vpop.permute.xlu1 %2066  ;;  %v2468_v47 = vld [vmem:[%s4537_s27 + $0x58] sm:$0xff] }
 0x7d1   : > { %3915 = vmatmul.mubr.msk.f32.vlgmr.msra.gmra.mrb[8].mxu0 %vm757_vm3, %v1751_v48  ;;  %v2457_v48 = vld [vmem:[%s4537_s27] sm:$0xff] }
 0x7d2   : > { %v4235_v49 = vpop.eup %4234  ;;  %3923 = vmatpush3.msra.mxu0 %v752_v44  ;;  %v2466_v44 = vld [vmem:[%s4537_s27 + $0x48] sm:$0xff] }
 0x7d3   : > { %v1752_v51 = vmul.f32 %v4235_v49, %v4231_v40  ;;  %3932 = vmatprep.subr.mxu0 %v4348_v10  ;;  %v2465_v49 = vld [vmem:[%s4537_s27 + $0x40] sm:$0xff] }
 0x7d5   : > { %3920 = vmatmul.mubr.msk.f32.vlgmr.msra.gmra.mrb[16].mxu1 %vm757_vm3, %v1752_v51  ;;  %v3962_v51 = vpack.c.bf16 %v2465_v49, %v2457_v48  ;;  %v2861_v48 = vld [vmem:[%s4552_s18] sm:$0xff]  ;;  %v2862_v49 = vld [vmem:[%s4552_s18 + $0x8] sm:$0xff] }
 0x7d6   : > { %3928 = vmatpush3.xpose.msk.msra.mxu1 %vm757_vm3, %v1991_v46  ;;  %3929 = vmatprep.mubr.msk.f32.mxu1 %vm4349_vm2, %v4348_v10  ;;  %v3960_v46 = vpack.c.bf16 %v2466_v44, %v2458_v43  ;;  %v2909_v43 = vld [vmem:[%s4552_s18 + $0x180] sm:$0xff]  ;;  %v2910_v44 = vld [vmem:[%s4552_s18 + $0x188] sm:$0xff] }
 0x7d7   : > { %3937 = vmatprep.subr.mxu1 %v4348_v10 }
 0x7d9   : > { %3930 = vmatmul.mubr.msk.f32.vlgmr.msra.gmra.mrb[18].mxu1 %vm757_vm3, %v1989_v52  ;;  %v2459_v52 = vld [vmem:[%s4537_s27 + $0x10] sm:$0xff] }
 0x7da   : > { %3939 = vmatprep.mubr.msk.f32.mxu1 %vm4349_vm2, %v4348_v10 }
 0x8a4   : > { %v1825_v53 = vpop.f32.mrb[8].mxu0 }
 0x8a5   : > { %v3916_v54 = vpop.f32.mrb[9].mxu0  ;;  %3924 = vmatprep.mubr.msk.f32.mxu0 %vm757_vm3, %v1825_v53  ;;  %v2467_v53 = vld [vmem:[%s4537_s27 + $0x50] sm:$0xff] }
 0x8a6   : > { %v3970_v54 = vpack.c.bf16 %v2467_v53, %v2459_v52  ;;  %v2893_v52 = vld [vmem:[%s4552_s18 + $0x100] sm:$0xff]  ;;  %v2894_v53 = vld [vmem:[%s4552_s18 + $0x108] sm:$0xff] }
 0x8a8   : > { %v1901_v55 = vpop.f32.mrb[16].mxu1 }
 0x8a9   : > { %v3921_v56 = vpop.f32.mrb[17].mxu1  ;;  %3925 = vmatmul.mubr.msk.f32.vlgmr.msra.gmra.mrb[6].mxu0 %vm757_vm3, %v1901_v55  ;;  %v2474_v55 = vld [vmem:[%s4537_s27 + $0x88] sm:$0xff] }
 0x8aa   : > { %3933 = vmatpush3.xpose.msk.msra.mxu0 %vm757_vm3, %v2069_v50  ;;  %3934 = vmatprep.mubr.msk.f32.mxu0 %vm4349_vm2, %v4348_v10  ;;  %v3968_v50 = vpack.c.bf16 %v2468_v47, %v2460_v45  ;;  %v2482_v56 = vld [vmem:[%s4537_s27 + $0xc8] sm:$0xff] }
 0x8ab   : > { %3942 = vmatprep.subr.mxu0 %v4348_v10 }
 0x8ac   : > { %v2062_v58 = vpop.f32.mrb[18].mxu1 }
 0x8ad   : > { %v3931_v59 = vpop.f32.mrb[19].mxu1  ;;  %3935 = vmatmul.mubr.msk.f32.vlgmr.msra.gmra.mrb[10].mxu0 %vm757_vm3, %v2067_v57  ;;  %v2144_v60 = vsel %vm757_vm3, %v2062_v58, -inf  ;;  %v2476_v57 = vld [vmem:[%s4537_s27 + $0x98] sm:$0xff] }
 0x8ae   : > { %2145 = vmax.xlane.f32.xlu0 %v2144_v60  ;;  %3944 = vmatprep.mubr.msk.f32.mxu0 %vm4349_vm2, %v4348_v10  ;;  %v2484_v59 = vld [vmem:[%s4537_s27 + $0xd8] sm:$0xff]  ;;  %v2473_v60 = vld [vmem:[%s4537_s27 + $0x80] sm:$0xff] }
 0x93b   : > { %v2146_v61 = vpop.xlane.xlu0 %2145 }
 0x93c   : > { %v2150_v62 = vsub.f32 %v2062_v58, %v2146_v61  ;;  %v3964_v58 = vpack.c.bf16 %v2482_v56, %v2474_v55  ;;  %v2481_v61 = vld [vmem:[%s4537_s27 + $0xc0] sm:$0xff]  ;;  %v2880_v55 = vld [vmem:[%s4552_s18 + $0x98] sm:$0xff]  ;;  %v2911_v56 = vld [vmem:[%s4552_s18 + $0x190] sm:$0xff] }
 0x93e   : > { %v2152_v63 = vmul.f32 1.442695, %v2150_v62  ;;  %v3972_v62 = vpack.c.bf16 %v2484_v59, %v2476_v57  ;;  %v2912_v57 = vld [vmem:[%s4552_s18 + $0x198] sm:$0xff]  ;;  %v4026_v59 = vpack.c.bf16 %v2894_v53, %v2893_v52  ;;  %v2889_v52 = vld [vmem:[%s4552_s18 + $0xe0] sm:$0xff]  ;;  %v2890_v53 = vld [vmem:[%s4552_s18 + $0xe8] sm:$0xff] }
 0x940   : > { %4236 = vpow2.f32 %v2152_v63  ;;  %v3966_v63 = vpack.c.bf16 %v2481_v61, %v2473_v60  ;;  %v2863_v60 = vld [vmem:[%s4552_s18 + $0x10] sm:$0xff]  ;;  %v2864_v61 = vld [vmem:[%s4552_s18 + $0x18] sm:$0xff] }
 0x94a   : > { %v4237_v0 = vpop.eup %4236 }
 0x94b   : > { %v2156_v1 = vsel %vm757_vm3, %v4237_v0, 0.0 }
 0x94c   : > { %2157 = vadd.xlane.f32.xlu0 %v2156_v1  ;;  %v2483_v1 = vld [vmem:[%s4537_s27 + $0xd0] sm:$0xff] }
 0x980   : > { %v2140_v2 = vpop.f32.mrb[10].mxu0 }
 0x981   : > { %v3936_v3 = vpop.f32.mrb[11].mxu0  ;;  %v2147_v4 = vsel %vm757_vm3, %v2140_v2, -inf }
 0x982   : > { %2148 = vmax.xlane.f32.xlu1 %v2147_v4  ;;  %v2462_v3 = vld [vmem:[%s4537_s27 + $0x28] sm:$0xff] }
 0x983   : > { %v2470_v4 = vld [vmem:[%s4537_s27 + $0x68] sm:$0xff] }
 0x993   : > { %2166 = vrot.lane.b32.xlu1 %v4592_v14, %s4360_s20 }
 0x9d9   : > { %v2158_v5 = vpop.xlane.xlu0 %2157 }
 0x9da   : > { %4238 = vrcp.f32 %v2158_v5  ;;  %v2464_v5 = vld [vmem:[%s4537_s27 + $0x38] sm:$0xff] }
 0x9e4   : > { %v4239_v8 = vpop.eup %4238 }
 0x9e5   : > { %v2164_v13 = vmul.f32 %v4239_v8, %v4237_v0  ;;  %v2475_v0 = vld [vmem:[%s4537_s27 + $0x90] sm:$0xff]  ;;  %v2472_v8 = vld [vmem:[%s4537_s27 + $0x78] sm:$0xff] }
 0xa0f   : > { %v2149_v6 = vpop.xlane.xlu1 %2148 }
 0xa10   : > { %v2151_v11 = vsub.f32 %v2140_v2, %v2149_v6  ;;  %v3974_v2 = vpack.c.bf16 %v2483_v1, %v2475_v0  ;;  %v3976_v6 = vpack.c.bf16 %v2470_v4, %v2462_v3  ;;  %v2895_v0 = vld [vmem:[%s4552_s18 + $0x110] sm:$0xff]  ;;  %v2896_v1 = vld [vmem:[%s4552_s18 + $0x118] sm:$0xff]  ;;  %v2882_v3 = vld [vmem:[%s4552_s18 + $0xa8] sm:$0xff] }
 0xa11   : > { %v2913_v4 = vld [vmem:[%s4552_s18 + $0x1a0] sm:$0xff] }
 0xa12   : > { %v2154_v12 = vmul.f32 1.442695, %v2151_v11  ;;  %v3984_v11 = vpack.c.bf16 %v2472_v8, %v2464_v5  ;;  %v2914_v5 = vld [vmem:[%s4552_s18 + $0x1a8] sm:$0xff]  ;;  %v4030_v8 = vpack.c.bf16 %v2896_v1, %v2895_v0 }
 0xa13   : > { %v2167_v16 = vpop.permute.xlu1 %2166 }
 0xa14   : > { %4240 = vpow2.f32 %v2154_v12  ;;  %3938 = vmatpush3.msra.mxu1 %v2167_v16 }
 0xa15   : > { %3940 = vmatmul.mubr.msk.f32.vlgmr.msra.gmra.mrb[20].mxu1 %vm757_vm3, %v2164_v13  ;;  %3961 = vmatprep.subr.bf16.mxu1 %v3960_v46 }
 0xa16   : > { %2601 = vmatprep.mubr.f32.mxu1 %v4348_v10  ;;  %3963 = vmatpush1.bf16.msra.mxu1 %v3962_v51  ;;  %v4024_v51 = vpack.c.bf16 %v2910_v44, %v2909_v43 }
 0xa17   : > { %3965 = vmatprep.subr.bf16.mxu1 %v3964_v58  ;;  %v3994_v58 = vpack.c.bf16 %v2862_v49, %v2861_v48 }
 0xa1a   : > { %3967 = vmatpush1.bf16.msra.mxu1 %v3966_v63  ;;  %v4028_v63 = vpack.c.bf16 %v2912_v57, %v2911_v56 }
 0xa1b   : > { %3977 = vmatprep.subr.bf16.mxu1 %v3976_v6  ;;  %v3998_v6 = vpack.c.bf16 %v2864_v61, %v2863_v60  ;;  %v2874_v61 = vld [vmem:[%s4552_s18 + $0x68] sm:$0xff] }
 0xa1e   : > { %v4241_v17 = vpop.eup %4240 }
 0xa1f   : > { %v2159_v18 = vsel %vm757_vm3, %v4241_v17, 0.0 }
 0xa20   : > { %2160 = vadd.xlane.f32.xlu0 %v2159_v18 }
 0xa36   : > { %2242 = vrot.lane.b32.xlu0 %v4595_v15, %s4360_s20  ;;  %v3613_v15 = vld [vmem:[%s5132_s3] ss:$0 sm:$0xff] }
 0xaad   : > { %v2161_v14 = vpop.xlane.xlu0 %2160 }
 0xaae   : > { %4242 = vrcp.f32 %v2161_v14 }
 0xab1   : > { %v2243_v20 = vpop.permute.xlu0 %2242 }
 0xab2   : > { %3943 = vmatpush3.msra.mxu0 %v2243_v20 }
 0xab3   : > { %3947 = vmatprep.subr.mxu0 %v753_v19 }
 0xab8   : > { %v4243_v21 = vpop.eup %4242 }
 0xab9   : > { %v2165_v22 = vmul.f32 %v4243_v21, %v4241_v17  ;;  %v3614_v21 = vld [vmem:[%s636_s0] ss:$0 sm:$0xff] }
 0xabb   : > { %3945 = vmatmul.mubr.msk.f32.vlgmr.msra.gmra.mrb[12].mxu0 %vm757_vm3, %v2165_v22  ;;  %v2461_v22 = vld [vmem:[%s4537_s27 + $0x20] sm:$0xff] }
 0xabc   : > { %3948 = vmatpush3.msra.mxu0 %v753_v19 }
 0xabd   : > { %3969 = vmatprep.subr.bf16.mxu0 %v3968_v50 }
 0xae8   : > { %v2238_v23 = vpop.f32.mrb[20].mxu1 }
 0xae9   : > { %v3941_v24 = vpop.f32.mrb[21].mxu1  ;;  %3949 = vmatprep.mubr.msk.f32.mxu0 %vm757_vm3, %v2238_v23 }
 0xb8e   : > { %v2314_v25 = vpop.f32.mrb[12].mxu0 }
 0xb8f   : > { %v3946_v26 = vpop.f32.mrb[13].mxu0  ;;  %3950 = vmatmul.mubr.msk.f32.vlgmr.msra.gmra.mrb[6].mxu0 %vm757_vm3, %v2314_v25  ;;  %v2469_v25 = vld [vmem:[%s4537_s27 + $0x60] sm:$0xff] }
 0xb90   : > { %2678 = vmatprep.mubr.f32.mxu0 %v4348_v10  ;;  %3971 = vmatpush1.bf16.msra.mxu0 %v3970_v54  ;;  %v2463_v26 = vld [vmem:[%s4537_s27 + $0x30] sm:$0xff] }
 0xb91   : > { %3973 = vmatprep.subr.bf16.mxu0 %v3972_v62  ;;  %v2879_v54 = vld [vmem:[%s4552_s18 + $0x90] sm:$0xff] }
 0xb92   : > { %v3996_v62 = vpack.c.bf16 %v2880_v55, %v2879_v54  ;;  %v2921_v54 = vld [vmem:[%s4552_s18 + $0x1e0] sm:$0xff]  ;;  %v2922_v55 = vld [vmem:[%s4552_s18 + $0x1e8] sm:$0xff] }
 0xb93   : > { %v4048_v60 = vpack.c.bf16 %v2922_v55, %v2921_v54  ;;  %v2927_v54 = vld [vmem:[%s4552_s18 + $0x210] sm:$0xff] }
 0xb94   : > { %3975 = vmatpush1.bf16.msra.mxu0 %v3974_v2  ;;  %v2881_v2 = vld [vmem:[%s4552_s18 + $0xa0] sm:$0xff] }
 0xb95   : > { %3985 = vmatprep.subr.bf16.mxu0 %v3984_v11  ;;  %v2865_v11 = vld [vmem:[%s4552_s18 + $0x20] sm:$0xff] }
 0xc62   : > { %v3951_v27 = vpop.f32.mrb[6].mxu0 }
 0xc63   : > { %v2409_v28 = vadd.f32 %v3951_v27, %v3613_v15  ;;  %v2390_v29 = vpop.f32.mrb[7].mxu0  ;;  %v3615_v27 = vld [vmem:[%s639_s1] ss:$0 sm:$0xff] }
 0xc64   : > { %v2408_v30 = vadd.f32 %v3613_v15, %v2390_v29  ;;  %v2471_v15 = vld [vmem:[%s4537_s27 + $0x70] sm:$0xff] }
 0xc65   : > { %v2411_v31 = vadd.f32 %v2409_v28, %v4577_v9  ;;  %v2478_v28 = vld [vmem:[%s4537_s27 + $0xa8] sm:$0xff] }
 0xc66   : > { %v2410_v32 = vadd.f32 %v2408_v30, %v4573_v7  ;;  %v2486_v30 = vld [vmem:[%s4537_s27 + $0xe8] sm:$0xff] }
 0xc67   : > { %v2417_v33 = vsel %vm668_vm1, %v2411_v31, 0.0 }
 0xc68   : > { %2418 = vadd.xlane.f32.xlu0 %v2417_v33  ;;  %v2414_v34 = vsel %vm668_vm1, %v2410_v32, 0.0  ;;  %v3978_v33 = vpack.c.bf16 %v2469_v25, %v2461_v22 }
 0xc69   : > { %2415 = vadd.xlane.f32.xlu1 %v2414_v34  ;;  %v3986_v34 = vpack.c.bf16 %v2471_v15, %v2463_v26  ;;  %v2899_v15 = vld [vmem:[%s4552_s18 + $0x130] sm:$0xff] }
 0xcf5   : > { %v2419_v35 = vpop.xlane.xlu0 %2418 }
 0xcf6   : > { %v2422_v36 = vmul.f32 0.03125, %v2419_v35  ;;  %v2416_v37 = vpop.xlane.xlu1 %2415  ;;  %v2477_v35 = vld [vmem:[%s4537_s27 + $0xa0] sm:$0xff] }
 0xcf7   : > { %v2421_v38 = vmul.f32 0.03125, %v2416_v37 }
 0xcf8   : > { %v2424_v39 = vsub.f32 %v2411_v31, %v2422_v36  ;;  %v2480_v31 = vld [vmem:[%s4537_s27 + $0xb8] sm:$0xff] }
 0xcf9   : > { %v2423_v9 = vsub.f32 %v2410_v32, %v2421_v38  ;;  %v2488_v32 = vld [vmem:[%s4537_s27 + $0xf8] sm:$0xff]  ;;  %v2485_v38 = vld [vmem:[%s4537_s27 + $0xe0] sm:$0xff] }
 0xcfa   : > { %v2426_v7 = vmul.f32 %v2424_v39, %v2424_v39  ;;  %v3982_v45 = vpack.c.bf16 %v2485_v38, %v2477_v35  ;;  %v2870_v35 = vld [vmem:[%s4552_s18 + $0x48] sm:$0xff] }
 0xcfb   : > { %v2425_v40 = vmul.f32 %v2423_v9, %v2423_v9 }
 0xcfc   : > { %v2430_v41 = vsel %vm668_vm1, %v2426_v7, 0.0  ;;  %v3980_v7 = vpack.c.bf16 %v2486_v30, %v2478_v28  ;;  %v2885_v28 = vld [vmem:[%s4552_s18 + $0xc0] sm:$0xff] }
 0xcfd   : > { %2431 = vadd.xlane.f32.xlu0 %v2430_v41  ;;  %v2427_v42 = vsel %vm668_vm1, %v2425_v40, 0.0  ;;  %v3988_v40 = vpack.c.bf16 %v2488_v32, %v2480_v31  ;;  %v2877_v41 = vld [vmem:[%s4552_s18 + $0x80] sm:$0xff]  ;;  %v2918_v31 = vld [vmem:[%s4552_s18 + $0x1c8] sm:$0xff] }
 0xcfe   : > { %2428 = vadd.xlane.f32.xlu1 %v2427_v42  ;;  %v2878_v42 = vld [vmem:[%s4552_s18 + $0x88] sm:$0xff]  ;;  %v2917_v30 = vld [vmem:[%s4552_s18 + $0x1c0] sm:$0xff] }
 0xcff   : > { %v3992_v50 = vpack.c.bf16 %v2878_v42, %v2877_v41  ;;  %v4040_v38 = vpack.c.bf16 %v2918_v31, %v2917_v30  ;;  %v2919_v41 = vld [vmem:[%s4552_s18 + $0x1d0] sm:$0xff]  ;;  %v2920_v42 = vld [vmem:[%s4552_s18 + $0x1d8] sm:$0xff] }
 0xd00   : > { %v4044_v49 = vpack.c.bf16 %v2920_v42, %v2919_v41 }
 0xd8a   : > { %v2432_v12 = vpop.xlane.xlu0 %2431 }
 0xd8b   : > { %v2434_v13 = vmul.f32 0.03125, %v2432_v12  ;;  %v2429_v16 = vpop.xlane.xlu1 %2428  ;;  %v2866_v12 = vld [vmem:[%s4552_s18 + $0x28] sm:$0xff] }
 0xd8c   : > { %v2433_v17 = vmul.f32 0.03125, %v2429_v16  ;;  %v4032_v16 = vpack.c.bf16 %v2914_v5, %v2913_v4  ;;  %v2923_v4 = vld [vmem:[%s4552_s18 + $0x1f0] sm:$0xff] }
 0xd8d   : > { %v2436_v18 = vadd.f32 1e-05, %v2434_v13  ;;  %v4000_v13 = vpack.c.bf16 %v2882_v3, %v2881_v2  ;;  %v2891_v2 = vld [vmem:[%s4552_s18 + $0xf0] sm:$0xff]  ;;  %v2892_v3 = vld [vmem:[%s4552_s18 + $0xf8] sm:$0xff] }
 0xd8e   : > { %v2435_v14 = vadd.f32 1e-05, %v2433_v17  ;;  %v2897_v17 = vld [vmem:[%s4552_s18 + $0x120] sm:$0xff]  ;;  %v4020_v5 = vpack.c.bf16 %v2892_v3, %v2891_v2 }
 0xd8f   : > { %4244 = vrsqrt.f32 %v2436_v18  ;;  %v2898_v18 = vld [vmem:[%s4552_s18 + $0x128] sm:$0xff] }
 0xd90   : > { %4246 = vrsqrt.f32 %v2435_v14  ;;  %v2883_v14 = vld [vmem:[%s4552_s18 + $0xb0] sm:$0xff]  ;;  %v4034_v22 = vpack.c.bf16 %v2898_v18, %v2897_v17  ;;  %v2908_v17 = vld [vmem:[%s4552_s18 + $0x178] sm:$0xff] }
 0xd99   : > { %v4245_v19 = vpop.eup %4244 }
 0xd9a   : > { %v4247_v20 = vpop.eup %4246  ;;  %v2440_v23 = vmul.f32 %v4245_v19, %v2424_v39  ;;  %v2479_v39 = vld [vmem:[%s4537_s27 + $0xb0] sm:$0xff] }
 0xd9b   : > { %v2439_v24 = vmul.f32 %v4247_v20, %v2423_v9  ;;  %v2487_v9 = vld [vmem:[%s4537_s27 + $0xf0] sm:$0xff]  ;;  %v2916_v20 = vld [vmem:[%s4552_s18 + $0x1b8] sm:$0xff] }
 0xd9c   : > { %v2448_v37 = vmul.f32 %v3614_v21, %v2440_v23  ;;  %v3990_v46 = vpack.c.bf16 %v2487_v9, %v2479_v39  ;;  %v2915_v19 = vld [vmem:[%s4552_s18 + $0x1b0] sm:$0xff]  ;;  %v2901_v39 = vld [vmem:[%s4552_s18 + $0x140] sm:$0xff]  ;;  %v2902_v9 = vld [vmem:[%s4552_s18 + $0x148] sm:$0xff] }
 0xd9d   : > { %v2447_v29 = vmul.f32 %v3614_v21, %v2439_v24  ;;  %v4002_v21 = vpack.c.bf16 %v2866_v12, %v2865_v11  ;;  %v2867_v23 = vld [vmem:[%s4552_s18 + $0x30] sm:$0xff]  ;;  %v2868_v24 = vld [vmem:[%s4552_s18 + $0x38] sm:$0xff]  ;;  %v4036_v26 = vpack.c.bf16 %v2916_v20, %v2915_v19  ;;  %v4042_v44 = vpack.c.bf16 %v2902_v9, %v2901_v39  ;;  %v2973_v19 = vld [vmem:[%s4552_s18 + $0x380] sm:$0xff] }
 0xd9e   : > { %v4791_v47 = vadd.f32 %v3615_v27, %v2448_v37  ;;  %v4006_v32 = vpack.c.bf16 %v2868_v24, %v2867_v23  ;;  %v2876_v11 = vld [vmem:[%s4552_s18 + $0x78] sm:$0xff]  ;;  %v2491_v23 = vlaneseq  ;;  %v2957_v39 = vld [vmem:[%s4552_s18 + $0x300] sm:$0xff]  ;;  %v2958_v9 = vld [vmem:[%s4552_s18 + $0x308] sm:$0xff] }
 0xd9f   : > { %v4776_v36 = vadd.f32 %v3615_v27, %v2447_v29  ;;  %v2900_v27 = vld [vmem:[%s4552_s18 + $0x138] sm:$0xff]  ;;  %v2886_v29 = vld [vmem:[%s4552_s18 + $0xc8] sm:$0xff] }
 0xda0   : > { %v4008_v37 = vpack.c.bf16 %v2886_v29, %v2885_v28  ;;  %v4873_v24 = vshrl.u32 %v2491_v23, 7  ;;  %v2930_v23 = vld [vmem:[%s4552_s18 + $0x228] sm:$0xff] }
 0xda1   : > { %3616 = vmatmul.mubr.msk.f32.vlgmr.msra.gmra.mrb[22].mxu1 %vm668_vm1, %v4776_v36  ;;  %3618 = vmatmul.mubr.msk.f32.vlgmr.msra.gmra.mrb[14].mxu0 %vm668_vm1, %v4776_v36 }
 0xda2   : > { %3979 = vmatpush1.bf16.msra.mxu1 %v3978_v33  ;;  %3987 = vmatpush1.bf16.msra.mxu0 %v3986_v34  ;;  %v4038_v33 = vpack.c.bf16 %v2900_v27, %v2899_v15  ;;  %v2869_v34 = vld [vmem:[%s4552_s18 + $0x40] sm:$0xff]  ;;  %v2497_v27 = vsub.s32 1, %v4873_v24  ;;  %v2505_v28 = vsub.s32 3, %v4873_v24 }
 0xda3   : > { %2607 = vmatprep.mubr.f32.mxu1 %v4348_v10  ;;  %2684 = vmatprep.mubr.f32.mxu0 %v4348_v10  ;;  %v4010_v43 = vpack.c.bf16 %v2870_v35, %v2869_v34  ;;  %v4878_v15 = vld [vmem:[%s4542_s25] sm:$0xff]  ;;  %v2926_v34 = vld [vmem:[%s4552_s18 + $0x208] sm:$0xff]  ;;  %v2513_v35 = vsub.s32 5, %v4873_v24 }
 0xda4   : > { %3981 = vmatprep.subr.bf16.mxu1 %v3980_v7  ;;  %3989 = vmatprep.subr.bf16.mxu0 %v3988_v40  ;;  %v2887_v7 = vld [vmem:[%s4552_s18 + $0xd0] sm:$0xff]  ;;  %v2888_v40 = vld [vmem:[%s4552_s18 + $0xd8] sm:$0xff]  ;;  %v2498_v31 = vrot.slane %v4878_v15, %v2497_v27 }
 0xda5   : > { %3617 = vmatmul.mubr.msk.f32.gmra.mrb[24].mxu1 %vm668_vm1, %v4791_v47  ;;  %3619 = vmatmul.mubr.msk.f32.gmra.mrb[16].mxu0 %vm668_vm1, %v4791_v47  ;;  %v4012_v48 = vpack.c.bf16 %v2888_v40, %v2887_v7  ;;  %v2943_v7 = vld [vmem:[%s4552_s18 + $0x290] sm:$0xff] }
 0xda6   : > { %3983 = vmatpush1.bf16.msra.mxu1 %v3982_v45  ;;  %3991 = vmatpush1.bf16.msra.mxu0 %v3990_v46  ;;  %v2871_v45 = vld [vmem:[%s4552_s18 + $0x50] sm:$0xff]  ;;  %v2872_v46 = vld [vmem:[%s4552_s18 + $0x58] sm:$0xff] }
 0xda7   : > { %2755 = vmatprep.mubr.f32.mxu1 %v4348_v10  ;;  %2832 = vmatprep.mubr.f32.mxu0 %v4348_v10  ;;  %v4014_v56 = vpack.c.bf16 %v2872_v46, %v2871_v45  ;;  %v2975_v45 = vld [vmem:[%s4552_s18 + $0x390] sm:$0xff]  ;;  %v2976_v46 = vld [vmem:[%s4552_s18 + $0x398] sm:$0xff] }
 0xda8   : > { %3993 = vmatprep.subr.bf16.mxu1 %v3992_v50  ;;  %4025 = vmatprep.subr.bf16.mxu0 %v4024_v51  ;;  %v2903_v50 = vld [vmem:[%s4552_s18 + $0x150] sm:$0xff]  ;;  %v2904_v51 = vld [vmem:[%s4552_s18 + $0x158] sm:$0xff] }
 0xda9   : > { %3620 = vmatmul.mubr.msk.f32.vlgmr.msra.gmra.mrb[26].mxu1 %vm668_vm1, %v4776_v36  ;;  %3622 = vmatmul.mubr.msk.f32.vlgmr.msra.gmra.mrb[18].mxu0 %vm668_vm1, %v4776_v36  ;;  %v4046_v57 = vpack.c.bf16 %v2904_v51, %v2903_v50  ;;  %v2521_v50 = vsub.s32 7, %v4873_v24 }
 0xdaa   : > { %2761 = vmatprep.mubr.f32.mxu1 %v4348_v10  ;;  %2838 = vmatprep.mubr.f32.mxu0 %v4348_v10  ;;  %v2884_v10 = vld [vmem:[%s4552_s18 + $0xb8] sm:$0xff] }
 0xdab   : > { %3995 = vmatpush3.bf16.msra.mxu1 %v3994_v58  ;;  %4027 = vmatpush3.bf16.msra.mxu0 %v4026_v59  ;;  %v4004_v25 = vpack.c.bf16 %v2884_v10, %v2883_v14  ;;  %v2873_v58 = vld [vmem:[%s4552_s18 + $0x60] sm:$0xff]  ;;  %v4016_v59 = vpack.c.bf16 %v2890_v53, %v2889_v52  ;;  %v2942_v10 = vld [vmem:[%s4552_s18 + $0x288] sm:$0xff]  ;;  %v4090_v52 = vpack.c.bf16 %v2958_v9, %v2957_v39  ;;  %v2980_v39 = vld [vmem:[%s4552_s18 + $0x3b8] sm:$0xff] }
 0xdac   : > { %3997 = vmatprep.subr.bf16.mxu1 %v3996_v62  ;;  %4029 = vmatprep.subr.bf16.mxu0 %v4028_v63  ;;  %v2905_v62 = vld [vmem:[%s4552_s18 + $0x160] sm:$0xff]  ;;  %v2906_v63 = vld [vmem:[%s4552_s18 + $0x168] sm:$0xff]  ;;  %v4018_v0 = vpack.c.bf16 %v2874_v61, %v2873_v58  ;;  %v4897_v53 = vrot.slane %v4878_v15, %v2513_v35  ;;  %v2928_v61 = vld [vmem:[%s4552_s18 + $0x218] sm:$0xff] }
 0xdad   : > { %3621 = vmatmul.mubr.msk.f32.gmra.mrb[28].mxu1 %vm668_vm1, %v4791_v47  ;;  %3623 = vmatmul.mubr.msk.f32.gmra.mrb[20].mxu0 %vm668_vm1, %v4791_v47  ;;  %v4050_v1 = vpack.c.bf16 %v2906_v63, %v2905_v62  ;;  %v2941_v14 = vld [vmem:[%s4552_s18 + $0x280] sm:$0xff]  ;;  %v2959_v62 = vld [vmem:[%s4552_s18 + $0x310] sm:$0xff] }
 0xdae   : > { %v4056_v20 = vpack.c.bf16 %v2942_v10, %v2941_v14 }
 0xdaf   : > { %3999 = vmatpush3.bf16.msra.mxu1 %v3998_v6  ;;  %4031 = vmatpush3.bf16.msra.mxu0 %v4030_v8  ;;  %v2924_v6 = vld [vmem:[%s4552_s18 + $0x1f8] sm:$0xff]  ;;  %v2875_v8 = vld [vmem:[%s4552_s18 + $0x70] sm:$0xff] }
 0xdb0   : > { %4001 = vmatprep.subr.bf16.mxu1 %v4000_v13  ;;  %4033 = vmatprep.subr.bf16.mxu0 %v4032_v16  ;;  %v4052_v12 = vpack.c.bf16 %v2924_v6, %v2923_v4  ;;  %v4022_v13 = vpack.c.bf16 %v2876_v11, %v2875_v8  ;;  %v2907_v16 = vld [vmem:[%s4552_s18 + $0x170] sm:$0xff]  ;;  %v2945_v6 = vld [vmem:[%s4552_s18 + $0x2a0] sm:$0xff] }
 0xdb1   : > { %v4054_v18 = vpack.c.bf16 %v2908_v17, %v2907_v16  ;;  %v2977_v16 = vld [vmem:[%s4552_s18 + $0x3a0] sm:$0xff]  ;;  %v2978_v17 = vld [vmem:[%s4552_s18 + $0x3a8] sm:$0xff] }
 0xdb3   : > { %4003 = vmatpush3.bf16.msra.mxu1 %v4002_v21  ;;  %4035 = vmatpush3.bf16.msra.mxu0 %v4034_v22  ;;  %v2974_v21 = vld [vmem:[%s4552_s18 + $0x388] sm:$0xff] }
 0xdb4   : > { %4005 = vmatprep.subr.bf16.mxu1 %v4004_v25  ;;  %4037 = vmatprep.subr.bf16.mxu0 %v4036_v26  ;;  %v4088_v22 = vpack.c.bf16 %v2974_v21, %v2973_v19  ;;  %v2493_v25 = vsub.s32 0, %v4873_v24  ;;  %v2501_v26 = vsub.s32 2, %v4873_v24  ;;  %v4062_v21 = vpack.c.bf16 %v2928_v61, %v2927_v54  ;;  %v2949_v54 = vld [vmem:[%s4552_s18 + $0x2c0] sm:$0xff]  ;;  %v2934_v61 = vld [vmem:[%s4552_s18 + $0x248] sm:$0xff] }
 0xdb6   : > { %v2494_v29 = vrot.slane %v4878_v15, %v2493_v25  ;;  %v2502_v30 = vrot.slane %v4878_v15, %v2501_v26  ;;  %v2961_v25 = vld [vmem:[%s4552_s18 + $0x320] sm:$0xff] }
 0xdb7   : > { %4007 = vmatpush3.bf16.msra.mxu1 %v4006_v32  ;;  %4039 = vmatpush3.bf16.msra.mxu0 %v4038_v33  ;;  %v2506_v32 = vrot.slane %v4878_v15, %v2505_v28  ;;  %v2925_v33 = vld [vmem:[%s4552_s18 + $0x200] sm:$0xff] }
 0xdb8   : > { %4009 = vmatprep.subr.bf16.mxu1 %v4008_v37  ;;  %4041 = vmatprep.subr.bf16.mxu0 %v4040_v38  ;;  %v4058_v51 = vpack.c.bf16 %v2926_v34, %v2925_v33  ;;  %v2947_v33 = vld [vmem:[%s4552_s18 + $0x2b0] sm:$0xff] }
 0xdbb   : > { %4011 = vmatpush3.bf16.msra.mxu1 %v4010_v43  ;;  %4043 = vmatpush3.bf16.msra.mxu0 %v4042_v44  ;;  %v2944_v44 = vld [vmem:[%s4552_s18 + $0x298] sm:$0xff] }
 0xdbc   : > { %4013 = vmatprep.subr.bf16.mxu1 %v4012_v48  ;;  %4045 = vmatprep.subr.bf16.mxu0 %v4044_v49 }
 0xdbf   : > { %4015 = vmatpush3.bf16.msra.mxu1 %v4014_v56  ;;  %4047 = vmatpush3.bf16.msra.mxu0 %v4046_v57 }
 0xdc0   : > { %4017 = vmatprep.subr.bf16.mxu1 %v4016_v59  ;;  %4049 = vmatprep.subr.bf16.mxu0 %v4048_v60  ;;  %v4060_v59 = vpack.c.bf16 %v2944_v44, %v2943_v7  ;;  %v4092_v60 = vpack.c.bf16 %v2976_v46, %v2975_v45  ;;  %v2931_v44 = vld [vmem:[%s4552_s18 + $0x230] sm:$0xff]  ;;  %v2932_v45 = vld [vmem:[%s4552_s18 + $0x238] sm:$0xff] }
 0xdc3   : > { %4019 = vmatpush3.bf16.msra.mxu1 %v4018_v0  ;;  %4051 = vmatpush3.bf16.msra.mxu0 %v4050_v1 }
 0xdc4   : > { %4021 = vmatprep.subr.bf16.mxu1 %v4020_v5  ;;  %4053 = vmatprep.subr.bf16.mxu0 %v4052_v12  ;;  %v2960_v5 = vld [vmem:[%s4552_s18 + $0x318] sm:$0xff]  ;;  %v4905_v12 = vrot.slane %v4878_v15, %v2521_v50 }
 0xdc7   : > { %4023 = vmatpush3.bf16.msra.mxu1 %v4022_v13  ;;  %4055 = vmatpush3.bf16.msra.mxu0 %v4054_v18  ;;  %v2946_v13 = vld [vmem:[%s4552_s18 + $0x2a8] sm:$0xff]  ;;  %v2929_v18 = vld [vmem:[%s4552_s18 + $0x220] sm:$0xff] }
 0xdc8   : > { %4057 = vmatprep.subr.bf16.mxu1 %v4056_v20  ;;  %4089 = vmatprep.subr.bf16.mxu0 %v4088_v22  ;;  %v4094_v22 = vpack.c.bf16 %v2960_v5, %v2959_v62  ;;  %v2984_v5 = vld [vmem:[%s4552_s18 + $0x3d8] sm:$0xff] }
 0xe74   : > { %v2603_v37 = vpop.f32.mrb[22].mxu1  ;;  %v2680_v38 = vpop.f32.mrb[14].mxu0 }
 0xe75   : > { %v2604_v40 = vadd.f32 %v2603_v37, %v2494_v29  ;;  %v2681_v41 = vadd.f32 %v2680_v38, %v2502_v30  ;;  %v2605_v42 = vpop.f32.mrb[23].mxu1  ;;  %v2682_v43 = vpop.f32.mrb[15].mxu0  ;;  %v2948_v37 = vld [vmem:[%s4552_s18 + $0x2b8] sm:$0xff]  ;;  %v2979_v38 = vld [vmem:[%s4552_s18 + $0x3b0] sm:$0xff] }
 0xe76   : > { %v2606_v48 = vadd.f32 %v2605_v42, %v2498_v31  ;;  %v2683_v49 = vadd.f32 %v2682_v43, %v2506_v32  ;;  %v4066_v42 = vpack.c.bf16 %v2930_v23, %v2929_v18  ;;  %v4100_v50 = vpack.c.bf16 %v2980_v39, %v2979_v38  ;;  %v2967_v18 = vld [vmem:[%s4552_s18 + $0x350] sm:$0xff]  ;;  %v2986_v23 = vld [vmem:[%s4552_s18 + $0x3e8] sm:$0xff]  ;;  %v2988_v39 = vld [vmem:[%s4552_s18 + $0x3f8] sm:$0xff] }
 0xe77   : > { %v2845_v63 = vmax.f32 %v2604_v40, 0.0  ;;  %v2847_v0 = vmax.f32 %v2681_v41, 0.0  ;;  %v2987_v38 = vld [vmem:[%s4552_s18 + $0x3f0] sm:$0xff] }
 0xe78   : > { %v2846_v55 = vmax.f32 %v2606_v48, 0.0  ;;  %v2848_v56 = vmax.f32 %v2683_v49, 0.0  ;;  %v2609_v57 = vpop.f32.mrb[24].mxu1  ;;  %v2686_v58 = vpop.f32.mrb[16].mxu0  ;;  %v4068_v49 = vpack.c.bf16 %v2948_v37, %v2947_v33  ;;  %v2969_v33 = vld [vmem:[%s4552_s18 + $0x360] sm:$0xff]  ;;  %v2956_v37 = vld [vmem:[%s4552_s18 + $0x2f8] sm:$0xff] }
 0xe79   : > { %v2610_v1 = vadd.f32 %v2609_v57, %v2494_v29  ;;  %v2687_v2 = vadd.f32 %v2686_v58, %v2502_v30  ;;  %v2611_v3 = vpop.f32.mrb[25].mxu1  ;;  %v2688_v4 = vpop.f32.mrb[17].mxu0  ;;  %v4064_v30 = vpack.c.bf16 %v2946_v13, %v2945_v6  ;;  %v2982_v57 = vld [vmem:[%s4552_s18 + $0x3c8] sm:$0xff]  ;;  %v4070_v58 = vpack.c.bf16 %v2932_v45, %v2931_v44  ;;  %v2936_v13 = vld [vmem:[%s4552_s18 + $0x258] sm:$0xff] }
 0xe7a   : > { %v2612_v8 = vadd.f32 %v2611_v3, %v2498_v31  ;;  %v2689_v11 = vadd.f32 %v2688_v4, %v2506_v32  ;;  %3060 = vmatprep.mubr.f32.mxu1 %v2846_v55  ;;  %3135 = vmatprep.mubr.f32.mxu0 %v2848_v56  ;;  %v4096_v31 = vpack.c.bf16 %v2978_v17, %v2977_v16  ;;  %v2962_v32 = vld [vmem:[%s4552_s18 + $0x328] sm:$0xff]  ;;  %v2981_v56 = vld [vmem:[%s4552_s18 + $0x3c0] sm:$0xff]  ;;  %v2952_v3 = vld [vmem:[%s4552_s18 + $0x2d8] sm:$0xff] }
 0xe7b   : > { %3061 = vmatmul.mubr.f32.vlgmr.msra.gmra.mrb[30].mxu1 %v2845_v63  ;;  %3136 = vmatmul.mubr.f32.vlgmr.msra.gmra.mrb[22].mxu0 %v2847_v0  ;;  %v2853_v26 = vmax.f32 %v2610_v1, 0.0  ;;  %v2855_v27 = vmax.f32 %v2687_v2, 0.0  ;;  %v4098_v43 = vpack.c.bf16 %v2962_v32, %v2961_v25  ;;  %v2950_v55 = vld [vmem:[%s4552_s18 + $0x2c8] sm:$0xff]  ;;  %v4104_v63 = vpack.c.bf16 %v2982_v57, %v2981_v56  ;;  %v2965_v0 = vld [vmem:[%s4552_s18 + $0x340] sm:$0xff]  ;;  %v2951_v2 = vld [vmem:[%s4552_s18 + $0x2d0] sm:$0xff] }
 0xe7c   : > { %v2854_v14 = vmax.f32 %v2612_v8, 0.0  ;;  %v2856_v10 = vmax.f32 %v2689_v11, 0.0  ;;  %4059 = vmatpush3.bf16.msra.mxu1 %v4058_v51  ;;  %4091 = vmatpush3.bf16.msra.mxu0 %v4090_v52  ;;  %v4911_v19 = vpop.f32.mrb[26].mxu1  ;;  %v4913_v20 = vpop.f32.mrb[18].mxu0  ;;  %v2963_v51 = vld [vmem:[%s4552_s18 + $0x330] sm:$0xff]  ;;  %v2964_v52 = vld [vmem:[%s4552_s18 + $0x338] sm:$0xff]  ;;  %v4072_v62 = vpack.c.bf16 %v2950_v55, %v2949_v54  ;;  %v4076_v16 = vpack.c.bf16 %v2952_v3, %v2951_v2 }
 0xe7d   : > { %v2759_v28 = vpop.f32.mrb[27].mxu1  ;;  %v2836_v29 = vpop.f32.mrb[19].mxu0  ;;  %4061 = vmatprep.subr.bf16.mxu1 %v4060_v59  ;;  %4093 = vmatprep.subr.bf16.mxu0 %v4092_v60  ;;  %v4102_v59 = vpack.c.bf16 %v2964_v52, %v2963_v51  ;;  %v2933_v60 = vld [vmem:[%s4552_s18 + $0x240] sm:$0xff]  ;;  %v2966_v1 = vld [vmem:[%s4552_s18 + $0x348] sm:$0xff]  ;;  %v2983_v4 = vld [vmem:[%s4552_s18 + $0x3d0] sm:$0xff]  ;;  %v2509_v25 = vsub.s32 4, %v4873_v24  ;;  %v4116_v45 = vpack.c.bf16 %v2988_v39, %v2987_v38 }
 0xe7e   : > { %v2760_v34 = vadd.f32 %v2759_v28, %v4897_v53  ;;  %v2837_v35 = vadd.f32 %v2836_v29, %v4905_v12  ;;  %3065 = vmatprep.mubr.f32.mxu1 %v2854_v14  ;;  %3140 = vmatprep.mubr.f32.mxu0 %v2856_v10  ;;  %v4074_v6 = vpack.c.bf16 %v2934_v61, %v2933_v60  ;;  %v2935_v11 = vld [vmem:[%s4552_s18 + $0x250] sm:$0xff]  ;;  %v2968_v14 = vld [vmem:[%s4552_s18 + $0x358] sm:$0xff]  ;;  %v2953_v10 = vld [vmem:[%s4552_s18 + $0x2e0] sm:$0xff] }
 0xe7f   : > { %3066 = vmatmul.mubr.f32.gmra.mrb[32].mxu1 %v2853_v26  ;;  %3141 = vmatmul.mubr.f32.gmra.mrb[24].mxu0 %v2855_v27  ;;  %v4106_v8 = vpack.c.bf16 %v2966_v1, %v2965_v0  ;;  %v4108_v17 = vpack.c.bf16 %v2984_v5, %v2983_v4  ;;  %v4078_v26 = vpack.c.bf16 %v2936_v13, %v2935_v11  ;;  %v2937_v28 = vld [vmem:[%s4552_s18 + $0x260] sm:$0xff]  ;;  %v2938_v29 = vld [vmem:[%s4552_s18 + $0x268] sm:$0xff]  ;;  %v2972_v51 = vld [vmem:[%s4552_s18 + $0x378] sm:$0xff] }
 0xe80   : > { %v2850_v9 = vmax.f32 %v2760_v34, 0.0  ;;  %v2852_v7 = vmax.f32 %v2837_v35, 0.0  ;;  %4063 = vmatpush3.bf16.msra.mxu1 %v4062_v21  ;;  %4095 = vmatpush3.bf16.msra.mxu0 %v4094_v22  ;;  %v4924_v40 = vpop.f32.mrb[28].mxu1  ;;  %v4926_v41 = vpop.f32.mrb[20].mxu0  ;;  %v2954_v21 = vld [vmem:[%s4552_s18 + $0x2e8] sm:$0xff]  ;;  %v2985_v22 = vld [vmem:[%s4552_s18 + $0x3e0] sm:$0xff]  ;;  %v4110_v27 = vpack.c.bf16 %v2968_v14, %v2967_v18 }
 0xe81   : > { %v4930_v46 = vpop.f32.mrb[29].mxu1  ;;  %v4932_v48 = vpop.f32.mrb[21].mxu0  ;;  %4065 = vmatprep.subr.bf16.mxu1 %v4064_v30  ;;  %4097 = vmatprep.subr.bf16.mxu0 %v4096_v31  ;;  %v2517_v30 = vsub.s32 6, %v4873_v24  ;;  %v4080_v31 = vpack.c.bf16 %v2954_v21, %v2953_v10  ;;  %v4112_v32 = vpack.c.bf16 %v2986_v23, %v2985_v22  ;;  %v2970_v34 = vld [vmem:[%s4552_s18 + $0x368] sm:$0xff]  ;;  %v2955_v35 = vld [vmem:[%s4552_s18 + $0x2f0] sm:$0xff] }
 0xe82   : > { %3210 = vmatprep.mubr.f32.mxu1 %v2850_v9  ;;  %3285 = vmatprep.mubr.f32.mxu0 %v2852_v7  ;;  %v2510_v9 = vrot.slane %v4878_v15, %v2509_v25  ;;  %v4082_v7 = vpack.c.bf16 %v2938_v29, %v2937_v28  ;;  %v4114_v24 = vpack.c.bf16 %v2970_v34, %v2969_v33 }
 0xe83   : > { %v4084_v44 = vpack.c.bf16 %v2956_v37, %v2955_v35  ;;  %v2843_v57 = vadd.f32 %v4932_v48, %v4905_v12 }
 0xe84   : > { %4067 = vmatpush3.bf16.msra.mxu1 %v4066_v42  ;;  %4099 = vmatpush3.bf16.msra.mxu0 %v4098_v43  ;;  %v2939_v42 = vld [vmem:[%s4552_s18 + $0x270] sm:$0xff]  ;;  %v2518_v43 = vrot.slane %v4878_v15, %v2517_v30  ;;  %v2758_v55 = vadd.f32 %v4911_v19, %v2510_v9  ;;  %v2766_v15 = vadd.f32 %v4930_v46, %v4897_v53 }
 0xe85   : > { %4069 = vmatprep.subr.bf16.mxu1 %v4068_v49  ;;  %4101 = vmatprep.subr.bf16.mxu0 %v4100_v50  ;;  %v2940_v49 = vld [vmem:[%s4552_s18 + $0x278] sm:$0xff]  ;;  %v2971_v50 = vld [vmem:[%s4552_s18 + $0x370] sm:$0xff]  ;;  %v2764_v60 = vadd.f32 %v4924_v40, %v2510_v9  ;;  %s5133_s18 = sld [smem:[#allocation24_spill]] }
 0xe86   : > { %v4086_v52 = vpack.c.bf16 %v2940_v49, %v2939_v42  ;;  %v4118_v54 = vpack.c.bf16 %v2972_v51, %v2971_v50  ;;  %v2835_v56 = vadd.f32 %v4913_v20, %v2518_v43  ;;  %v2841_v61 = vadd.f32 %v4926_v41, %v2518_v43 }
 0xe87   : > { %v2858_v19 = vmax.f32 %v2766_v15, 0.0  ;;  %v2857_v20 = vmax.f32 %v2764_v60, 0.0  ;;  %v3625_v15 = vld [vmem:[%s642_s5] ss:$0 sm:$0xff] }
 0xe88   : > { %4071 = vmatpush3.bf16.msra.mxu1 %v4070_v58  ;;  %4103 = vmatpush3.bf16.msra.mxu0 %v4102_v59  ;;  %v2849_v58 = vmax.f32 %v2758_v55, 0.0  ;;  %v2851_v59 = vmax.f32 %v2835_v56, 0.0  ;;  %v2859_v53 = vmax.f32 %v2841_v61, 0.0 }
 0xe89   : > { %4073 = vmatprep.subr.bf16.mxu1 %v4072_v62  ;;  %4105 = vmatprep.subr.bf16.mxu0 %v4104_v63  ;;  %v2860_v62 = vmax.f32 %v2843_v57, 0.0 }
 0xe8b   : > { %s5134_s0 = scalar_lea.vmem %s5133_s18, %s4510_s30 }
 0xe8c   : > { %4075 = vmatpush3.bf16.msra.mxu1 %v4074_v6  ;;  %4107 = vmatpush3.bf16.msra.mxu0 %v4106_v8  ;;  %v3624_v48 = vld [vmem:[%s5134_s0] ss:$0 sm:$0xff] }
 0xe8d   : > { %4077 = vmatprep.subr.bf16.mxu1 %v4076_v16  ;;  %4109 = vmatprep.subr.bf16.mxu0 %v4108_v17 }
 0xe90   : > { %4079 = vmatpush3.bf16.msra.mxu1 %v4078_v26  ;;  %4111 = vmatpush3.bf16.msra.mxu0 %v4110_v27 }
 0xe91   : > { %4081 = vmatprep.subr.bf16.mxu1 %v4080_v31  ;;  %4113 = vmatprep.subr.bf16.mxu0 %v4112_v32 }
 0xe94   : > { %4083 = vmatpush3.bf16.msra.mxu1 %v4082_v7  ;;  %4115 = vmatpush3.bf16.msra.mxu0 %v4114_v24 }
 0xe95   : > { %4085 = vmatprep.subr.bf16.mxu1 %v4084_v44  ;;  %4117 = vmatprep.subr.bf16.mxu0 %v4116_v45 }
 0xe98   : > { %4087 = vmatpush3.bf16.msra.mxu1 %v4086_v52  ;;  %4119 = vmatpush3.bf16.msra.mxu0 %v4118_v54 }
 0xe9b   : > { %3211 = vmatmul.mubr.f32.vlgmr.msra.gmra.mrb[34].mxu1 %v2849_v58  ;;  %3286 = vmatmul.mubr.f32.vlgmr.msra.gmra.mrb[26].mxu0 %v2851_v59  ;;  %v3626_v58 = vld [vmem:[%s645_s16] ss:$0 sm:$0xff] }
 0xe9c   : > { %3215 = vmatprep.mubr.f32.mxu1 %v2858_v19  ;;  %3290 = vmatprep.mubr.f32.mxu0 %v2860_v62 }
 0xe9f   : > { %3216 = vmatmul.mubr.f32.gmra.mrb[36].mxu1 %v2857_v20  ;;  %3291 = vmatmul.mubr.f32.gmra.mrb[28].mxu0 %v2859_v53 }
 0xf4e   : > { %v3721_v12 = vpop.f32.mrb[30].mxu1  ;;  %v3759_v46 = vpop.f32.mrb[22].mxu0 }
 0xf4f   : > { %v3722_v40 = vpop.f32.mrb[31].mxu1  ;;  %v3760_v63 = vpop.f32.mrb[23].mxu0 }
 0xf50   : > { %v3723_v41 = vadd.f32 %v3722_v40, %v3721_v12  ;;  %v3761_v0 = vadd.f32 %v3760_v63, %v3759_v46 }
 0xf52   : > { %v3063_v1 = vadd.f32 %v3723_v41, %v3624_v48  ;;  %v3724_v2 = vpop.f32.mrb[32].mxu1  ;;  %v3762_v3 = vpop.f32.mrb[24].mxu0 }
 0xf53   : > { %v3725_v4 = vpop.f32.mrb[33].mxu1  ;;  %v3763_v5 = vpop.f32.mrb[25].mxu0 }
 0xf54   : > { %v3138_v6 = vadd.f32 %v3761_v0, %v3063_v1  ;;  %v3726_v8 = vadd.f32 %v3725_v4, %v3724_v2  ;;  %v3764_v11 = vadd.f32 %v3763_v5, %v3762_v3 }
 0xf56   : > { %v3068_v13 = vadd.f32 %v3726_v8, %v3624_v48 }
 0xf58   : > { %v3143_v16 = vadd.f32 %v3764_v11, %v3068_v13 }
 0xf6e   : > { %v3797_v17 = vpop.f32.mrb[34].mxu1  ;;  %v3835_v18 = vpop.f32.mrb[26].mxu0 }
 0xf6f   : > { %v3798_v14 = vpop.f32.mrb[35].mxu1  ;;  %v3836_v10 = vpop.f32.mrb[27].mxu0 }
 0xf70   : > { %v3799_v21 = vadd.f32 %v3798_v14, %v3797_v17  ;;  %v3837_v22 = vadd.f32 %v3836_v10, %v3835_v18 }
 0xf72   : > { %v3213_v23 = vadd.f32 %v3799_v21, %v3138_v6  ;;  %v3800_v25 = vpop.f32.mrb[36].mxu1  ;;  %v3838_v26 = vpop.f32.mrb[28].mxu0 }
 0xf73   : > { %v3801_v27 = vpop.f32.mrb[37].mxu1  ;;  %v3839_v28 = vpop.f32.mrb[29].mxu0 }
 0xf74   : > { %v3288_v29 = vadd.f32 %v3837_v22, %v3213_v23  ;;  %v3802_v30 = vadd.f32 %v3801_v27, %v3800_v25  ;;  %v3840_v31 = vadd.f32 %v3839_v28, %v3838_v26 }
 0xf76   : > { %v3218_v32 = vadd.f32 %v3802_v30, %v3143_v16  ;;  %v3296_v33 = vadd.f32 %v3288_v29, %v4776_v36 }
 0xf78   : > { %v3293_v34 = vadd.f32 %v3840_v31, %v3218_v32  ;;  %v3300_v35 = vsel %vm668_vm1, %v3296_v33, 0.0 }
 0xf79   : > { %3301 = vadd.xlane.f32.xlu1 %v3300_v35 }
 0xf7a   : > { %v3297_v37 = vadd.f32 %v3293_v34, %v4791_v47 }
 0xf7c   : > { %v3303_v38 = vsel %vm668_vm1, %v3297_v37, 0.0 }
 0xf7d   : > { %3304 = vadd.xlane.f32.xlu0 %v3303_v38 }
0x1006   : > { %v3302_v39 = vpop.xlane.xlu1 %3301 }
0x1007   : > { %v3306_v9 = vmul.f32 0.03125, %v3302_v39 }
0x1009   : > { %v3308_v7 = vsub.f32 %v3296_v33, %v3306_v9 }
0x100a   : > { %v3305_v24 = vpop.xlane.xlu0 %3304 }
0x100b   : > { %v3307_v42 = vmul.f32 0.03125, %v3305_v24  ;;  %v3310_v43 = vmul.f32 %v3308_v7, %v3308_v7 }
0x100d   : > { %v3309_v44 = vsub.f32 %v3297_v37, %v3307_v42  ;;  %v3312_v45 = vsel %vm668_vm1, %v3310_v43, 0.0 }
0x100e   : > { %3313 = vadd.xlane.f32.xlu1 %v3312_v45 }
0x100f   : > { %v3311_v36 = vmul.f32 %v3309_v44, %v3309_v44 }
0x1011   : > { %v3315_v49 = vsel %vm668_vm1, %v3311_v36, 0.0 }
0x1012   : > { %3316 = vadd.xlane.f32.xlu0 %v3315_v49 }
0x109b   : > { %v3314_v47 = vpop.xlane.xlu1 %3313 }
0x109c   : > { %v3318_v50 = vmul.f32 0.03125, %v3314_v47 }
0x109e   : > { %v3320_v51 = vadd.f32 1e-05, %v3318_v50 }
0x109f   : > { %v3317_v52 = vpop.xlane.xlu0 %3316 }
0x10a0   : > { %4248 = vrsqrt.f32 %v3320_v51  ;;  %v3319_v54 = vmul.f32 0.03125, %v3317_v52 }
0x10a2   : > { %v3321_v55 = vadd.f32 1e-05, %v3319_v54 }
0x10a4   : > { %4250 = vrsqrt.f32 %v3321_v55 }
0x10aa   : > { %v4249_v56 = vpop.eup %4248 }
0x10ab   : > { %v3324_v57 = vmul.f32 %v4249_v56, %v3308_v7 }
0x10ad   : > { %v3332_v59 = vmul.f32 %v3625_v15, %v3324_v57 }
0x10ae   : > { %v4251_v60 = vpop.eup %4250 }
0x10af   : > { %v3340_v61 = vadd.f32 %v3626_v58, %v3332_v59  ;;  %v3325_v19 = vmul.f32 %v4251_v60, %v3309_v44  ;;  %3347 = sbr.rel (%p3627_p1) target bundleno = 4278 (0x10b6), region = 80 }
0x10b1   : > { %3342 = vst.msk [vmem:[#allocation2] sm:$0xff] %vm668_vm1, %v3340_v61  ;;  %v3333_v62 = vmul.f32 %v3625_v15, %v3325_v19  ;;  %3348 = vst.msk [vmem:[%s4570_s8] sm:$0xff] (!%p3627_p1), %vm668_vm1, %v3340_v61 }
0x10b3   : > { %v3341_v20 = vadd.f32 %v3626_v58, %v3333_v62 }
0x10b5   : > { %3343 = vst.msk [vmem:[#allocation2 + $0x8] sm:$0xff] %vm668_vm1, %v3341_v20  ;;  %3349 = vst.msk [vmem:[%s4570_s8 + $0x8] sm:$0xff] (!%p3627_p1), %vm668_vm1, %v3341_v20 }
0x10b6 PF: > { %s5137_s5 = sld [smem:[#allocation10_spill]]  ;;  %s5138_s30 = sld [smem:[#allocation7_spill]] }
0x10b7   : > { %s5140_s20 = sld [smem:[#allocation26_spill]]  ;;  %s3364_s29 = sshll.u32 %s4570_s8, 4  ;;  %s5015_s29 = int_to_ptr.vmem [resolvable:$true] %s3364_s29 }
0x10b8   : > { %s4252_s14 = scalar_lea.vmem %s5015_s29, 256  ;;  %s4361_s21 = smov [#allocation3]  }
0x10b9   : > { %p4253_p2 = scmp.ne.s32.totalorder %s5015_s29, %s4252_s14  ;;  %s4256_s17 = sshll.u32 %s4361_s21, 4  ;;  %s4257_s17 = int_to_ptr.vmem [resolvable:$false] %s4256_s17 }
0x10ba   : > { %s4258_s27 = scalar_lea.vmem %s4257_s17, 512  ;;  %p4259_p6 = scmp.lt.s32.totalorder %s5015_s29, %s4257_s17 }
0x10bb   : > { %p4254_p4 = pnand %p4253_p2, %p4483_p3  ;;  %p4260_p7 = scmp.lt.s32.totalorder %s4258_s27, %s4252_s14 }
0x10bc   : > { %s3638_s23 = sshll.u32 %s5137_s5, 8  ;;  %s5141_s3 = sand.u32 1, %s5138_s30  }
0x10bd   : > { %s5012_s13 = scalar_lea.hbm %s5140_s20, %s3638_s23  ;;  %s5019_s6 = scalar_lea.sflag [#allocation4], %s5141_s3 }
0x10be   : > { %p4255_p5 = pneg %p4254_p4  ;;  %p4261_p8 = por %p4260_p7, %p4259_p6 }
0x10c0   : > { %p4262_p10 = pnand %p4261_p8, %p4255_p5 }
0x10c2   : > { %4265 = shalt.err (!%p4262_p10)
}
0x10c3   : > { %s4266_s8 = scalar_lea.hbm %s5012_s13, 256  ;;  %s4270_s0 = scalar_lea.hbm %s5140_s20, 512 }
0x10c4   : > { %p4267_p11 = scmp.ne.s32.totalorder %s5012_s13, %s4266_s8  ;;  %p4271_p0 = scmp.lt.u32.totalorder %s5012_s13, %s5140_s20 }
0x10c5   : > { %p4272_p1 = scmp.lt.u32.totalorder %s4270_s0, %s4266_s8  ;;  %p4274_p4 = scmp.lt.u32.totalorder %s4266_s8, %s5012_s13 }
0x10c6   : > { %p4268_p12 = pnand %p4267_p11, %p4483_p3 }
0x10c7   : > { %p4273_p2 = por %p4272_p1, %p4271_p0 }
0x10c8   : > { %p4269_p13 = pneg %p4268_p12 }
0x10c9   : > { %p4275_p5 = por %p4274_p4, %p4273_p2 }
0x10cb   : > { %p4276_p6 = pnand %p4275_p5, %p4269_p13 }
0x10cd   : > { %4279 = shalt.err (!%p4276_p6)
}
0x10ce   : > { %s4362_s15 = smov 128   ;;  %s4363_s28 = smov 8  }
0x10cf   : > { %4126 = dma.vmem_to_hbm [thread:$0]  (%p4483_p3), %s5015_s29, 256, %s5012_s13, %s5019_s6, %s4362_s15, %s4362_s15, %s4363_s28  }
0x10d0 PF: > { %s5142_s12 = sld [smem:[#allocation13_spill]]  ;;  %s5143_s22 = sld [smem:[#allocation6_spill]] }
0x10d6   : > { %p4132_p7 = scmp.ge.s32.totalorder %s5142_s12, 2  ;;  %s3379_s30 = sand.u32 1, %s5143_s22  }
0x10d7   : > { %s3380_s23 = scalar_lea.sflag [#allocation4], %s3379_s30 }
0x10d8   : > { %p4129_p8 = pnand %p4132_p7, %p4493_p9 }
0x10da   : > { %4313 = dma.done.wait (!%p4129_p8), %s3380_s23, 256  }
0x10db   : > { %4315 = vsyncadd (!%p4129_p8), %s3380_s23, 4294967040  ;;  %s26_s15 = sadd.s32 1, %s5142_s12   ;;  %s5145_s25 = sld [smem:[#allocation7_spill]] }
0x10dc   : > { %p23_p10 = scmp.ge.s32.totalorder %s26_s15, 6   ;;  %s5146_s26 = sld [smem:[#allocation8_spill]] }
0x10dd   : > { %s5147_s27 = sld [smem:[#allocation18_spill]]  ;;  %s5148_s28 = sld [smem:[#allocation11_spill]] }
0x10de   : > { %s5149_s29 = sld [smem:[#allocation12_spill]]  ;;  %s5150_s30 = sld [smem:[#allocation14_spill]] }
0x10df   : > { %s5151_s14 = sld [smem:[#allocation16_spill]]  ;;  %25 = sbr.rel (!%p23_p10) target bundleno = 14 (0xe), region = 151 }
0x10e6   :  { %3385 = vsyncpa [#allocation4], 1 }
0x10e7   :  { %3387 = vsyncpa [#allocation4 + $0x1], 1 }

</bundles_post_ra>
